<compile_context>
chip_gen: v5e
topology: v5e:2x2
jax: 0.10.0
libtpu: 0.0.40
codegen_flags: <defaults>
</compile_context>

<pallas_src>
import math
from functools import partial

import jax
import jax.numpy as jnp
from jax.experimental import pallas as pl
from jax.experimental.pallas import tpu as pltpu


# ----------------------------- module helpers ------------------------------

def best_n_head(input_size: int) -> int:
    # same selection rule as the PyTorch bestNHead
    return min(
        (i for i in range(1, input_size + 1) if input_size // i * i == input_size),
        key=lambda i: abs((i * i - input_size) / (i * i)),
    )


def make_positional_encoding(max_len: int, d_model: int) -> jnp.ndarray:
    position = jnp.arange(max_len, dtype=jnp.float32)[:, None]
    div_term = jnp.exp(
        jnp.arange(0, d_model, 2, dtype=jnp.float32) * (-math.log(10000.0) / d_model)
    )
    pe = jnp.zeros((max_len, d_model), dtype=jnp.float32)
    pe = pe.at[:, 0::2].set(jnp.sin(position * div_term))
    pe = pe.at[:, 1::2].set(jnp.cos(position * div_term))
    return pe  # (max_len, d_model)


# ------------------------------- the kernel --------------------------------

def _layer_norm(x, w, b, eps=1e-5):
    mu = jnp.mean(x, axis=-1, keepdims=True)
    var = jnp.mean((x - mu) ** 2, axis=-1, keepdims=True)
    return (x - mu) * jax.lax.rsqrt(var + eps) * w + b


def transam_kernel(x_ref, pe_ref, bias_ref, vmask_ref,
                   wq_ref, bq_ref, wk_ref, bk_ref, wv_ref, bv_ref,
                   wo_ref, bo_ref, ln1w_ref, ln1b_ref,
                   ff1w_ref, ff1b_ref, ff2w_ref, ff2b_ref,
                   ln2w_ref, ln2b_ref, decw_ref, decb_ref,
                   o_ref, xf_ref, *, num_heads: int):
    S, B, D = x_ref.shape
    N = S * B
    H = num_heads
    bf16, f32 = jnp.bfloat16, jnp.float32
    l = pl.program_id(0)

    # ---- prologue (layer 0): positional encoding, flatten (S,B,D)->(N,D) ----
    @pl.when(l == 0)
    def _():
        xf_ref[...] = (x_ref[...] + pe_ref[...]).reshape(N, D)

    xf = xf_ref[...]                       # (N, D) f32 residual stream
    xb = xf.astype(bf16)

    # ---------------- self attention (post-norm encoder layer) --------------
    # q-scale (1/sqrt(hd)) is pre-folded into wq / bq on the host
    q = jnp.dot(xb, wq_ref[...], preferred_element_type=f32) + bq_ref[...]
    k = jnp.dot(xb, wk_ref[...], preferred_element_type=f32) + bk_ref[...]
    v = jnp.dot(xb, wv_ref[...], preferred_element_type=f32) + bv_ref[...]

    # head-expanded K_e / V_e: row (h*N + n) holds k[n]/v[n] restricted to
    # head h's hd-wide feature slice (vmask is the 0/1 head selector).
    vmask = vmask_ref[...]                                     # (H*N, D) bf16
    K_e = jnp.concatenate([k.astype(bf16)] * H, axis=0) * vmask
    V_e = jnp.concatenate([v.astype(bf16)] * H, axis=0) * vmask

    # all heads in one lane-dense (N, H*N) score tile
    s = jax.lax.dot_general(q.astype(bf16), K_e,
                            dimension_numbers=(((1,), (1,)), ((), ())),
                            preferred_element_type=f32)
    s = s + bias_ref[...]                                      # batch separation
    s = s - jnp.max(s, axis=-1, keepdims=True)                 # shared row shift
    e = jnp.exp(s).astype(bf16)                                # masked lanes -> 0

    num = jnp.dot(e, V_e, preferred_element_type=f32)          # (N, D) unnormalized
    den = jnp.dot(e, vmask, preferred_element_type=f32)        # per-head softmax denom
    attn = num * pl.reciprocal(den, approx=True)

    attn = jnp.dot(attn.astype(bf16), wo_ref[...],
                   preferred_element_type=f32) + bo_ref[...]
    x1 = _layer_norm(xf + attn, ln1w_ref[...], ln1b_ref[...])

    # ---------------- feed-forward (relu), early bf16 hid -------------------
    hid = jnp.maximum(
        jnp.dot(x1.astype(bf16), ff1w_ref[...],
                preferred_element_type=f32) + ff1b_ref[...],
        0.0).astype(bf16)
    ff = jnp.dot(hid, ff2w_ref[...], preferred_element_type=f32) + ff2b_ref[...]
    x2 = _layer_norm(x1 + ff, ln2w_ref[...], ln2b_ref[...])
    xf_ref[...] = x2

    # ---- epilogue (last layer): mean over BATCH axis (dim=1) + decoder -----
    @pl.when(l == pl.num_programs(0) - 1)
    def _():
        xm = jnp.mean(x2.reshape(S, B, D), axis=1)             # (S, D)
        o_ref[...] = jnp.dot(xm, decw_ref[...],
                             preferred_element_type=f32) + decb_ref[...]


# ------------------------------- wrapper ------------------------------------

def transam_forward(src, params, pe, *, num_layers, num_heads, cls_num):
    S, B, D = src.shape
    L, H = num_layers, num_heads
    hd = D // H
    N = S * B
    HN = H * N
    F = params['ff1_w'].shape[1]
    scale = 1.0 / math.sqrt(hd)
    Cp = max(128, ((cls_num + 127) // 128) * 128)
    bf16, f32 = jnp.bfloat16, jnp.float32

    # --- host-side weight prep: split QKV, pre-transpose, fold q-scale ------
    in_w, in_b = params['in_w'], params['in_b']                # (L,3D,D), (L,3D)
    wq = (jnp.transpose(in_w[:, 0:D, :], (0, 2, 1)) * scale).astype(bf16)
    wk = jnp.transpose(in_w[:, D:2 * D, :], (0, 2, 1)).astype(bf16)
    wv = jnp.transpose(in_w[:, 2 * D:3 * D, :], (0, 2, 1)).astype(bf16)
    bq = (in_b[:, 0:D] * scale).reshape(L, 1, D).astype(f32)
    bk = in_b[:, D:2 * D].reshape(L, 1, D).astype(f32)
    bv = in_b[:, 2 * D:3 * D].reshape(L, 1, D).astype(f32)
    wo = jnp.transpose(params['out_w'], (0, 2, 1)).astype(bf16)
    bo = params['out_b'].reshape(L, 1, D).astype(f32)
    ln1w = params['ln1_w'].reshape(L, 1, D).astype(f32)
    ln1b = params['ln1_b'].reshape(L, 1, D).astype(f32)
    ff1w = jnp.transpose(params['ff1_w'], (0, 2, 1)).astype(bf16)    # (L, D, F)
    ff1b = params['ff1_b'].reshape(L, 1, F).astype(f32)
    ff2w = jnp.transpose(params['ff2_w'], (0, 2, 1)).astype(bf16)    # (L, F, D)
    ff2b = params['ff2_b'].reshape(L, 1, D).astype(f32)
    ln2w = params['ln2_w'].reshape(L, 1, D).astype(f32)
    ln2b = params['ln2_b'].reshape(L, 1, D).astype(f32)

    # lane-dense decoder: (D, Cp) with the first cls_num columns valid
    decw = jnp.zeros((D, Cp), f32).at[:, :cls_num].set(params['dec_w'].T)
    decb = jnp.zeros((1, Cp), f32).at[0, :cls_num].set(params['dec_b'])

    # masks aligned to the flattened (N, H*N) score layout: col = h*N + n
    col = jnp.arange(HN, dtype=jnp.int32)
    row = jnp.arange(N, dtype=jnp.int32)
    attn_bias = jnp.where((row[:, None] % B) == ((col[None, :] % N) % B),
                          0.0, -1e30).astype(f32)                    # (N, HN)
    d_idx = jnp.arange(D, dtype=jnp.int32)
    vmask = ((col[:, None] // N) == (d_idx[None, :] // hd)).astype(bf16)  # (HN, D)

    pe_s = pe[:S].astype(f32)[:, None, :]                            # (S, 1, D)

    args = (src.astype(f32), pe_s, attn_bias, vmask,
            wq, bq, wk, bk, wv, bv, wo, bo, ln1w, ln1b,
            ff1w, ff1b, ff2w, ff2b, ln2w, ln2b, decw, decb)

    def const_spec(shape):
        nd = len(shape)
        def imap(l):
            return (0,) * nd
        return pl.BlockSpec(tuple(shape), imap)

    def layer_spec(tail):
        nt = len(tail)
        def imap(l):
            return (l,) + (0,) * nt
        return pl.BlockSpec((None,) + tuple(tail), imap)

    in_specs = [
        const_spec((S, B, D)), const_spec((S, 1, D)),
        const_spec((N, HN)), const_spec((HN, D)),
        layer_spec((D, D)), layer_spec((1, D)),      # wq, bq
        layer_spec((D, D)), layer_spec((1, D)),      # wk, bk
        layer_spec((D, D)), layer_spec((1, D)),      # wv, bv
        layer_spec((D, D)), layer_spec((1, D)),      # wo, bo
        layer_spec((1, D)), layer_spec((1, D)),      # ln1w, ln1b
        layer_spec((D, F)), layer_spec((1, F)),      # ff1w, ff1b
        layer_spec((F, D)), layer_spec((1, D)),      # ff2w, ff2b
        layer_spec((1, D)), layer_spec((1, D)),      # ln2w, ln2b
        const_spec((D, Cp)), const_spec((1, Cp)),    # decw, decb
    ]

    flops = (L * (8 * N * D * D + 6 * N * HN * D + 4 * N * D * F)
             + 2 * S * D * Cp)
    transcendentals = L * N * HN
    bytes_accessed = (sum(int(a.size) * a.dtype.itemsize for a in args)
                      + S * Cp * 4)

    kernel = partial(transam_kernel, num_heads=H)
    out_padded = pl.pallas_call(
        kernel,
        out_shape=jax.ShapeDtypeStruct((S, Cp), f32),
        grid=(L,),
        in_specs=in_specs,
        out_specs=pl.BlockSpec((S, Cp), lambda l: (0, 0)),
        scratch_shapes=[pltpu.VMEM((N, D), f32)],
        compiler_params=pltpu.CompilerParams(dimension_semantics=("arbitrary",)),
        cost_estimate=pl.CostEstimate(flops=int(flops),
                                      transcendentals=int(transcendentals),
                                      bytes_accessed=int(bytes_accessed)),
    )(*args)
    return out_padded[:, :cls_num]


# --------------------------- pure-JAX reference -----------------------------

def transam_ref(src, params, pe, *, num_layers, num_heads):
    S, B, D = src.shape
    H = num_heads
    hd = D // H

    def ln(v, w, b):
        mu = v.mean(-1, keepdims=True)
        var = ((v - mu) ** 2).mean(-1, keepdims=True)
        return (v - mu) / jnp.sqrt(var + 1e-5) * w + b

    x = src + pe[:S][:, None, :]
    for l in range(num_layers):
        qkv = x @ params['in_w'][l].T + params['in_b'][l]
        q, k, v = jnp.split(qkv, 3, axis=-1)
        q = q.reshape(S, B, H, hd) / math.sqrt(hd)
        k = k.reshape(S, B, H, hd)
        v = v.reshape(S, B, H, hd)
        s = jnp.einsum('sbhe,tbhe->bhst', q, k)
        p = jax.nn.softmax(s, axis=-1)
        o = jnp.einsum('bhst,tbhe->sbhe', p, v).reshape(S, B, D)
        o = o @ params['out_w'][l].T + params['out_b'][l]
        x = ln(x + o, params['ln1_w'][l], params['ln1_b'][l])
        f = jax.nn.relu(x @ params['ff1_w'][l].T + params['ff1_b'][l])
        f = f @ params['ff2_w'][l].T + params['ff2_b'][l]
        x = ln(x + f, params['ln2_w'][l], params['ln2_b'][l])
    xm = x.mean(axis=1)
    return xm @ params['dec_w'].T + params['dec_b']


# ------------------------------- main ----------------------------------------

if __name__ == "__main__":
    # small, module-consistent sizes
    S, B = 8, 2               # sequence length, batch
    D = 32                    # inputSize (d_model)
    C = 5                     # clsNum
    L = 2                     # num_layers (module default)
    F = 2048                  # dim_feedforward (PyTorch TransformerEncoderLayer default)
    H = best_n_head(D)        # = 8 for D=32

    key = jax.random.PRNGKey(0)
    ks = jax.random.split(key, 10)

    def u(k, shape, scale=0.1):
        return jax.random.uniform(k, shape, jnp.float32, -scale, scale)

    # deterministic synthetic parameters (layers stacked on leading L axis,
    # PyTorch weight orientation: (out_features, in_features))
    params = {
        'in_w':  u(ks[0], (L, 3 * D, D)),
        'in_b':  u(ks[1], (L, 3 * D), 0.05),
        'out_w': u(ks[2], (L, D, D)),
        'out_b': u(ks[3], (L, D), 0.05),
        'ln1_w': jnp.ones((L, D), jnp.float32),
        'ln1_b': jnp.zeros((L, D), jnp.float32),
        'ln2_w': jnp.ones((L, D), jnp.float32),
        'ln2_b': jnp.zeros((L, D), jnp.float32),
        'ff1_w': u(ks[4], (L, F, D)),
        'ff1_b': u(ks[5], (L, F), 0.05),
        'ff2_w': u(ks[6], (L, D, F)),
        'ff2_b': u(ks[7], (L, D), 0.05),
        'dec_w': u(ks[8], (C, D)),                    # decoder.weight ~ U(-0.1, 0.1)
        'dec_b': jnp.zeros((C,), jnp.float32),        # decoder.bias zeroed
    }

    pe = make_positional_encoding(max_len=50, d_model=D)
    src = jax.random.normal(ks[9], (S, B, D), jnp.float32)

    out = transam_forward(src, params, pe, num_layers=L, num_heads=H, cls_num=C)
    out = jax.block_until_ready(out)

    ref = transam_ref(src, params, pe, num_layers=L, num_heads=H)
    assert out.shape == (S, C)
    # bf16 MXU operands (f32 accumulation) + approx softmax reciprocal
    # -> tolerance loosened vs. pure f32
    assert jnp.allclose(out, ref, rtol=3e-2, atol=3e-2), (
        f"max abs err = {jnp.max(jnp.abs(out - ref))}")

    print("KERNEL_OK")
</pallas_src>

<mosaic_0001>
module attributes {stable_mosaic.version = 11 : i64} {
  func.func @transam_kernel(%arg0: i32, %arg1: memref<8x2x32xf32, #tpu.memory_space<vmem>>, %arg2: memref<8x1x32xf32, #tpu.memory_space<vmem>>, %arg3: memref<16x128xf32, #tpu.memory_space<vmem>>, %arg4: memref<128x32xbf16, #tpu.memory_space<vmem>>, %arg5: memref<1x32x32xbf16, #tpu.memory_space<vmem>>, %arg6: memref<1x1x32xf32, #tpu.memory_space<vmem>>, %arg7: memref<1x32x32xbf16, #tpu.memory_space<vmem>>, %arg8: memref<1x1x32xf32, #tpu.memory_space<vmem>>, %arg9: memref<1x32x32xbf16, #tpu.memory_space<vmem>>, %arg10: memref<1x1x32xf32, #tpu.memory_space<vmem>>, %arg11: memref<1x32x32xbf16, #tpu.memory_space<vmem>>, %arg12: memref<1x1x32xf32, #tpu.memory_space<vmem>>, %arg13: memref<1x1x32xf32, #tpu.memory_space<vmem>>, %arg14: memref<1x1x32xf32, #tpu.memory_space<vmem>>, %arg15: memref<1x32x2048xbf16, #tpu.memory_space<vmem>>, %arg16: memref<1x1x2048xf32, #tpu.memory_space<vmem>>, %arg17: memref<1x2048x32xbf16, #tpu.memory_space<vmem>>, %arg18: memref<1x1x32xf32, #tpu.memory_space<vmem>>, %arg19: memref<1x1x32xf32, #tpu.memory_space<vmem>>, %arg20: memref<1x1x32xf32, #tpu.memory_space<vmem>>, %arg21: memref<32x128xf32, #tpu.memory_space<vmem>>, %arg22: memref<1x128xf32, #tpu.memory_space<vmem>>, %arg23: memref<8x128xf32, #tpu.memory_space<vmem>>, %arg24: memref<16x32xf32, #tpu.memory_space<vmem>>) attributes {dimension_semantics = [#tpu.dimension_semantics<arbitrary>], iteration_bounds = array<i64: 2>, scalar_prefetch = 0 : i64, scratch_operands = 1 : i64, tpu.core_type = #tpu.core_type<tc>, window_params = [{pipeline_mode = #tpu.pipeline_mode<synchronous>, transform_indices = @transform_0, window_bounds = array<i64: 8, 2, 32>}, {pipeline_mode = #tpu.pipeline_mode<synchronous>, transform_indices = @transform_1, window_bounds = array<i64: 8, 1, 32>}, {pipeline_mode = #tpu.pipeline_mode<synchronous>, transform_indices = @transform_2, window_bounds = array<i64: 16, 128>}, {pipeline_mode = #tpu.pipeline_mode<synchronous>, transform_indices = @transform_3, window_bounds = array<i64: 128, 32>}, {transform_indices = @transform_4, window_bounds = array<i64: 1, 32, 32>}, {transform_indices = @transform_5, window_bounds = array<i64: 1, 1, 32>}, {transform_indices = @transform_6, window_bounds = array<i64: 1, 32, 32>}, {transform_indices = @transform_7, window_bounds = array<i64: 1, 1, 32>}, {transform_indices = @transform_8, window_bounds = array<i64: 1, 32, 32>}, {transform_indices = @transform_9, window_bounds = array<i64: 1, 1, 32>}, {transform_indices = @transform_10, window_bounds = array<i64: 1, 32, 32>}, {transform_indices = @transform_11, window_bounds = array<i64: 1, 1, 32>}, {transform_indices = @transform_12, window_bounds = array<i64: 1, 1, 32>}, {transform_indices = @transform_13, window_bounds = array<i64: 1, 1, 32>}, {transform_indices = @transform_14, window_bounds = array<i64: 1, 32, 2048>}, {transform_indices = @transform_15, window_bounds = array<i64: 1, 1, 2048>}, {transform_indices = @transform_16, window_bounds = array<i64: 1, 2048, 32>}, {transform_indices = @transform_17, window_bounds = array<i64: 1, 1, 32>}, {transform_indices = @transform_18, window_bounds = array<i64: 1, 1, 32>}, {transform_indices = @transform_19, window_bounds = array<i64: 1, 1, 32>}, {pipeline_mode = #tpu.pipeline_mode<synchronous>, transform_indices = @transform_20, window_bounds = array<i64: 32, 128>}, {pipeline_mode = #tpu.pipeline_mode<synchronous>, transform_indices = @transform_21, window_bounds = array<i64: 1, 128>}, {pipeline_mode = #tpu.pipeline_mode<synchronous>, transform_indices = @transform_22, window_bounds = array<i64: 8, 128>}]} {
    %c0_i32 = arith.constant 0 : i32
    %0 = arith.cmpi eq, %arg0, %c0_i32 : i32
    %1 = arith.extui %0 : i1 to i32
    %c0_i32_0 = arith.constant 0 : i32
    %2 = arith.cmpi ne, %1, %c0_i32_0 : i32
    scf.if %2 {
      %c0_77 = arith.constant 0 : index
      %c0_78 = arith.constant 0 : index
      %c0_79 = arith.constant 0 : index
      %131 = vector.load %arg1[%c0_77, %c0_78, %c0_79] : memref<8x2x32xf32, #tpu.memory_space<vmem>>, vector<8x2x32xf32>
      %c0_80 = arith.constant 0 : index
      %c0_81 = arith.constant 0 : index
      %c0_82 = arith.constant 0 : index
      %132 = vector.load %arg2[%c0_80, %c0_81, %c0_82] : memref<8x1x32xf32, #tpu.memory_space<vmem>>, vector<8x1x32xf32>
      %133 = vector.broadcast %132 : vector<8x1x32xf32> to vector<8x2x32xf32>
      %134 = arith.addf %131, %133 : vector<8x2x32xf32>
      %135 = vector.shape_cast %134 : vector<8x2x32xf32> to vector<16x32xf32>
      %c0_83 = arith.constant 0 : index
      %c0_84 = arith.constant 0 : index
      %136 = vector.load %arg24[%c0_83, %c0_84] : memref<16x32xf32, #tpu.memory_space<vmem>>, vector<16x32xf32>
      tpu.vector_store %arg24[%c0_83, %c0_84], %135 {strides = array<i32>} : memref<16x32xf32, #tpu.memory_space<vmem>>, vector<16x32xf32>,
    } else {
    }
    %c0 = arith.constant 0 : index
    %c0_1 = arith.constant 0 : index
    %3 = vector.load %arg24[%c0, %c0_1] : memref<16x32xf32, #tpu.memory_space<vmem>>, vector<16x32xf32>
    %4 = arith.truncf %3 : vector<16x32xf32> to vector<16x32xbf16>
    %c0_2 = arith.constant 0 : index
    %c0_3 = arith.constant 0 : index
    %c0_4 = arith.constant 0 : index
    %5 = vector.load %arg5[%c0_2, %c0_3, %c0_4] : memref<1x32x32xbf16, #tpu.memory_space<vmem>>, vector<1x32x32xbf16>
    %6 = vector.shape_cast %5 : vector<1x32x32xbf16> to vector<32x32xbf16>
    %cst = arith.constant dense<0.000000e+00> : vector<16x32xf32>
    %7 = tpu.matmul %4, %6, %cst {dimension_numbers = #tpu.dot_dimension_numbers<[1], [0], [0], [1], [0, 0, 1, 1], [], []>} : vector<16x32xbf16>, vector<32x32xbf16>, vector<16x32xf32> -> vector<16x32xf32>
    %c0_5 = arith.constant 0 : index
    %c0_6 = arith.constant 0 : index
    %c0_7 = arith.constant 0 : index
    %8 = vector.load %arg6[%c0_5, %c0_6, %c0_7] : memref<1x1x32xf32, #tpu.memory_space<vmem>>, vector<1x1x32xf32>
    %9 = vector.shape_cast %8 : vector<1x1x32xf32> to vector<1x32xf32>
    %10 = vector.broadcast %9 : vector<1x32xf32> to vector<16x32xf32>
    %11 = arith.addf %7, %10 : vector<16x32xf32>
    %c0_8 = arith.constant 0 : index
    %c0_9 = arith.constant 0 : index
    %c0_10 = arith.constant 0 : index
    %12 = vector.load %arg7[%c0_8, %c0_9, %c0_10] : memref<1x32x32xbf16, #tpu.memory_space<vmem>>, vector<1x32x32xbf16>
    %13 = vector.shape_cast %12 : vector<1x32x32xbf16> to vector<32x32xbf16>
    %cst_11 = arith.constant dense<0.000000e+00> : vector<16x32xf32>
    %14 = tpu.matmul %4, %13, %cst_11 {dimension_numbers = #tpu.dot_dimension_numbers<[1], [0], [0], [1], [0, 0, 1, 1], [], []>} : vector<16x32xbf16>, vector<32x32xbf16>, vector<16x32xf32> -> vector<16x32xf32>
    %c0_12 = arith.constant 0 : index
    %c0_13 = arith.constant 0 : index
    %c0_14 = arith.constant 0 : index
    %15 = vector.load %arg8[%c0_12, %c0_13, %c0_14] : memref<1x1x32xf32, #tpu.memory_space<vmem>>, vector<1x1x32xf32>
    %16 = vector.shape_cast %15 : vector<1x1x32xf32> to vector<1x32xf32>
    %17 = vector.broadcast %16 : vector<1x32xf32> to vector<16x32xf32>
    %18 = arith.addf %14, %17 : vector<16x32xf32>
    %c0_15 = arith.constant 0 : index
    %c0_16 = arith.constant 0 : index
    %c0_17 = arith.constant 0 : index
    %19 = vector.load %arg9[%c0_15, %c0_16, %c0_17] : memref<1x32x32xbf16, #tpu.memory_space<vmem>>, vector<1x32x32xbf16>
    %20 = vector.shape_cast %19 : vector<1x32x32xbf16> to vector<32x32xbf16>
    %cst_18 = arith.constant dense<0.000000e+00> : vector<16x32xf32>
    %21 = tpu.matmul %4, %20, %cst_18 {dimension_numbers = #tpu.dot_dimension_numbers<[1], [0], [0], [1], [0, 0, 1, 1], [], []>} : vector<16x32xbf16>, vector<32x32xbf16>, vector<16x32xf32> -> vector<16x32xf32>
    %c0_19 = arith.constant 0 : index
    %c0_20 = arith.constant 0 : index
    %c0_21 = arith.constant 0 : index
    %22 = vector.load %arg10[%c0_19, %c0_20, %c0_21] : memref<1x1x32xf32, #tpu.memory_space<vmem>>, vector<1x1x32xf32>
    %23 = vector.shape_cast %22 : vector<1x1x32xf32> to vector<1x32xf32>
    %24 = vector.broadcast %23 : vector<1x32xf32> to vector<16x32xf32>
    %25 = arith.addf %21, %24 : vector<16x32xf32>
    %c0_22 = arith.constant 0 : index
    %c0_23 = arith.constant 0 : index
    %26 = vector.load %arg4[%c0_22, %c0_23] : memref<128x32xbf16, #tpu.memory_space<vmem>>, vector<128x32xbf16>
    %27 = arith.truncf %18 : vector<16x32xf32> to vector<16x32xbf16>
    %28 = tpu.concatenate %27, %27, %27, %27, %27, %27, %27, %27 in 0 : vector<16x32xbf16>, vector<16x32xbf16>, vector<16x32xbf16>, vector<16x32xbf16>, vector<16x32xbf16>, vector<16x32xbf16>, vector<16x32xbf16>, vector<16x32xbf16> -> vector<128x32xbf16>
    %29 = arith.mulf %28, %26 : vector<128x32xbf16>
    %30 = arith.truncf %25 : vector<16x32xf32> to vector<16x32xbf16>
    %31 = tpu.concatenate %30, %30, %30, %30, %30, %30, %30, %30 in 0 : vector<16x32xbf16>, vector<16x32xbf16>, vector<16x32xbf16>, vector<16x32xbf16>, vector<16x32xbf16>, vector<16x32xbf16>, vector<16x32xbf16>, vector<16x32xbf16> -> vector<128x32xbf16>
    %32 = arith.mulf %31, %26 : vector<128x32xbf16>
    %33 = arith.truncf %11 : vector<16x32xf32> to vector<16x32xbf16>
    %cst_24 = arith.constant dense<0.000000e+00> : vector<16x128xf32>
    %34 = tpu.matmul %33, %29, %cst_24 {dimension_numbers = #tpu.dot_dimension_numbers<[1], [1], [0], [0], [0, 0, 1, 0], [], []>} : vector<16x32xbf16>, vector<128x32xbf16>, vector<16x128xf32> -> vector<16x128xf32>
    %c0_25 = arith.constant 0 : index
    %c0_26 = arith.constant 0 : index
    %35 = vector.load %arg3[%c0_25, %c0_26] : memref<16x128xf32, #tpu.memory_space<vmem>>, vector<16x128xf32>
    %36 = arith.addf %34, %35 : vector<16x128xf32>
    %cst_27 = arith.constant dense<0xFF800000> : vector<16xf32>
    %37 = vector.multi_reduction <maximumf>, %36, %cst_27 [1] : vector<16x128xf32> to vector<16xf32>
    %38 = vector.shape_cast %37 : vector<16xf32> to vector<16x1xf32>
    %39 = vector.broadcast %38 : vector<16x1xf32> to vector<16x128xf32>
    %40 = arith.subf %36, %39 : vector<16x128xf32>
    %41 = math.exp %40 : vector<16x128xf32>
    %42 = arith.truncf %41 : vector<16x128xf32> to vector<16x128xbf16>
    %cst_28 = arith.constant dense<0.000000e+00> : vector<16x32xf32>
    %43 = tpu.matmul %42, %32, %cst_28 {dimension_numbers = #tpu.dot_dimension_numbers<[1], [0], [0], [1], [0, 0, 1, 1], [], []>} : vector<16x128xbf16>, vector<128x32xbf16>, vector<16x32xf32> -> vector<16x32xf32>
    %cst_29 = arith.constant dense<0.000000e+00> : vector<16x32xf32>
    %44 = tpu.matmul %42, %26, %cst_29 {dimension_numbers = #tpu.dot_dimension_numbers<[1], [0], [0], [1], [0, 0, 1, 1], [], []>} : vector<16x128xbf16>, vector<128x32xbf16>, vector<16x32xf32> -> vector<16x32xf32>
    %45 = tpu.reciprocal %44 {approx = true} : vector<16x32xf32> -> vector<16x32xf32>
    %46 = arith.mulf %43, %45 : vector<16x32xf32>
    %47 = arith.truncf %46 : vector<16x32xf32> to vector<16x32xbf16>
    %c0_30 = arith.constant 0 : index
    %c0_31 = arith.constant 0 : index
    %c0_32 = arith.constant 0 : index
    %48 = vector.load %arg11[%c0_30, %c0_31, %c0_32] : memref<1x32x32xbf16, #tpu.memory_space<vmem>>, vector<1x32x32xbf16>
    %49 = vector.shape_cast %48 : vector<1x32x32xbf16> to vector<32x32xbf16>
    %cst_33 = arith.constant dense<0.000000e+00> : vector<16x32xf32>
    %50 = tpu.matmul %47, %49, %cst_33 {dimension_numbers = #tpu.dot_dimension_numbers<[1], [0], [0], [1], [0, 0, 1, 1], [], []>} : vector<16x32xbf16>, vector<32x32xbf16>, vector<16x32xf32> -> vector<16x32xf32>
    %c0_34 = arith.constant 0 : index
    %c0_35 = arith.constant 0 : index
    %c0_36 = arith.constant 0 : index
    %51 = vector.load %arg12[%c0_34, %c0_35, %c0_36] : memref<1x1x32xf32, #tpu.memory_space<vmem>>, vector<1x1x32xf32>
    %52 = vector.shape_cast %51 : vector<1x1x32xf32> to vector<1x32xf32>
    %53 = vector.broadcast %52 : vector<1x32xf32> to vector<16x32xf32>
    %54 = arith.addf %50, %53 : vector<16x32xf32>
    %55 = arith.addf %3, %54 : vector<16x32xf32>
    %c0_37 = arith.constant 0 : index
    %c0_38 = arith.constant 0 : index
    %c0_39 = arith.constant 0 : index
    %56 = vector.load %arg13[%c0_37, %c0_38, %c0_39] : memref<1x1x32xf32, #tpu.memory_space<vmem>>, vector<1x1x32xf32>
    %57 = vector.shape_cast %56 : vector<1x1x32xf32> to vector<1x32xf32>
    %c0_40 = arith.constant 0 : index
    %c0_41 = arith.constant 0 : index
    %c0_42 = arith.constant 0 : index
    %58 = vector.load %arg14[%c0_40, %c0_41, %c0_42] : memref<1x1x32xf32, #tpu.memory_space<vmem>>, vector<1x1x32xf32>
    %59 = vector.shape_cast %58 : vector<1x1x32xf32> to vector<1x32xf32>
    %cst_43 = arith.constant dense<0.000000e+00> : vector<16xf32>
    %60 = vector.multi_reduction <add>, %55, %cst_43 [1] : vector<16x32xf32> to vector<16xf32>
    %61 = vector.shape_cast %60 : vector<16xf32> to vector<16x1xf32>
    %cst_44 = arith.constant 3.200000e+01 : f32
    %62 = vector.broadcast %cst_44 : f32 to vector<16x1xf32>
    %63 = arith.divf %61, %62 : vector<16x1xf32>
    %64 = vector.broadcast %63 : vector<16x1xf32> to vector<16x32xf32>
    %65 = arith.subf %55, %64 : vector<16x32xf32>
    %66 = arith.mulf %65, %65 : vector<16x32xf32>
    %cst_45 = arith.constant dense<0.000000e+00> : vector<16xf32>
    %67 = vector.multi_reduction <add>, %66, %cst_45 [1] : vector<16x32xf32> to vector<16xf32>
    %68 = vector.shape_cast %67 : vector<16xf32> to vector<16x1xf32>
    %cst_46 = arith.constant 3.200000e+01 : f32
    %69 = vector.broadcast %cst_46 : f32 to vector<16x1xf32>
    %70 = arith.divf %68, %69 : vector<16x1xf32>
    %71 = vector.broadcast %63 : vector<16x1xf32> to vector<16x32xf32>
    %72 = arith.subf %55, %71 : vector<16x32xf32>
    %cst_47 = arith.constant 9.99999974E-6 : f32
    %73 = vector.broadcast %cst_47 : f32 to vector<16x1xf32>
    %74 = arith.addf %70, %73 : vector<16x1xf32>
    %75 = math.rsqrt %74 : vector<16x1xf32>
    %76 = vector.broadcast %75 : vector<16x1xf32> to vector<16x32xf32>
    %77 = arith.mulf %72, %76 : vector<16x32xf32>
    %78 = vector.broadcast %57 : vector<1x32xf32> to vector<16x32xf32>
    %79 = arith.mulf %77, %78 : vector<16x32xf32>
    %80 = vector.broadcast %59 : vector<1x32xf32> to vector<16x32xf32>
    %81 = arith.addf %79, %80 : vector<16x32xf32>
    %82 = arith.truncf %81 : vector<16x32xf32> to vector<16x32xbf16>
    %c0_48 = arith.constant 0 : index
    %c0_49 = arith.constant 0 : index
    %c0_50 = arith.constant 0 : index
    %83 = vector.load %arg15[%c0_48, %c0_49, %c0_50] : memref<1x32x2048xbf16, #tpu.memory_space<vmem>>, vector<1x32x2048xbf16>
    %84 = vector.shape_cast %83 : vector<1x32x2048xbf16> to vector<32x2048xbf16>
    %cst_51 = arith.constant dense<0.000000e+00> : vector<16x2048xf32>
    %85 = tpu.matmul %82, %84, %cst_51 {dimension_numbers = #tpu.dot_dimension_numbers<[1], [0], [0], [1], [0, 0, 1, 1], [], []>} : vector<16x32xbf16>, vector<32x2048xbf16>, vector<16x2048xf32> -> vector<16x2048xf32>
    %c0_52 = arith.constant 0 : index
    %c0_53 = arith.constant 0 : index
    %c0_54 = arith.constant 0 : index
    %86 = vector.load %arg16[%c0_52, %c0_53, %c0_54] : memref<1x1x2048xf32, #tpu.memory_space<vmem>>, vector<1x1x2048xf32>
    %87 = vector.shape_cast %86 : vector<1x1x2048xf32> to vector<1x2048xf32>
    %88 = vector.broadcast %87 : vector<1x2048xf32> to vector<16x2048xf32>
    %89 = arith.addf %85, %88 : vector<16x2048xf32>
    %cst_55 = arith.constant 0.000000e+00 : f32
    %90 = vector.broadcast %cst_55 : f32 to vector<16x2048xf32>
    %91 = arith.maximumf %89, %90 : vector<16x2048xf32>
    %92 = arith.truncf %91 : vector<16x2048xf32> to vector<16x2048xbf16>
    %c0_56 = arith.constant 0 : index
    %c0_57 = arith.constant 0 : index
    %c0_58 = arith.constant 0 : index
    %93 = vector.load %arg17[%c0_56, %c0_57, %c0_58] : memref<1x2048x32xbf16, #tpu.memory_space<vmem>>, vector<1x2048x32xbf16>
    %94 = vector.shape_cast %93 : vector<1x2048x32xbf16> to vector<2048x32xbf16>
    %cst_59 = arith.constant dense<0.000000e+00> : vector<16x32xf32>
    %95 = tpu.matmul %92, %94, %cst_59 {dimension_numbers = #tpu.dot_dimension_numbers<[1], [0], [0], [1], [0, 0, 1, 1], [], []>} : vector<16x2048xbf16>, vector<2048x32xbf16>, vector<16x32xf32> -> vector<16x32xf32>
    %c0_60 = arith.constant 0 : index
    %c0_61 = arith.constant 0 : index
    %c0_62 = arith.constant 0 : index
    %96 = vector.load %arg18[%c0_60, %c0_61, %c0_62] : memref<1x1x32xf32, #tpu.memory_space<vmem>>, vector<1x1x32xf32>
    %97 = vector.shape_cast %96 : vector<1x1x32xf32> to vector<1x32xf32>
    %98 = vector.broadcast %97 : vector<1x32xf32> to vector<16x32xf32>
    %99 = arith.addf %95, %98 : vector<16x32xf32>
    %100 = arith.addf %81, %99 : vector<16x32xf32>
    %c0_63 = arith.constant 0 : index
    %c0_64 = arith.constant 0 : index
    %c0_65 = arith.constant 0 : index
    %101 = vector.load %arg19[%c0_63, %c0_64, %c0_65] : memref<1x1x32xf32, #tpu.memory_space<vmem>>, vector<1x1x32xf32>
    %102 = vector.shape_cast %101 : vector<1x1x32xf32> to vector<1x32xf32>
    %c0_66 = arith.constant 0 : index
    %c0_67 = arith.constant 0 : index
    %c0_68 = arith.constant 0 : index
    %103 = vector.load %arg20[%c0_66, %c0_67, %c0_68] : memref<1x1x32xf32, #tpu.memory_space<vmem>>, vector<1x1x32xf32>
    %104 = vector.shape_cast %103 : vector<1x1x32xf32> to vector<1x32xf32>
    %cst_69 = arith.constant dense<0.000000e+00> : vector<16xf32>
    %105 = vector.multi_reduction <add>, %100, %cst_69 [1] : vector<16x32xf32> to vector<16xf32>
    %106 = vector.shape_cast %105 : vector<16xf32> to vector<16x1xf32>
    %cst_70 = arith.constant 3.200000e+01 : f32
    %107 = vector.broadcast %cst_70 : f32 to vector<16x1xf32>
    %108 = arith.divf %106, %107 : vector<16x1xf32>
    %109 = vector.broadcast %108 : vector<16x1xf32> to vector<16x32xf32>
    %110 = arith.subf %100, %109 : vector<16x32xf32>
    %111 = arith.mulf %110, %110 : vector<16x32xf32>
    %cst_71 = arith.constant dense<0.000000e+00> : vector<16xf32>
    %112 = vector.multi_reduction <add>, %111, %cst_71 [1] : vector<16x32xf32> to vector<16xf32>
    %113 = vector.shape_cast %112 : vector<16xf32> to vector<16x1xf32>
    %cst_72 = arith.constant 3.200000e+01 : f32
    %114 = vector.broadcast %cst_72 : f32 to vector<16x1xf32>
    %115 = arith.divf %113, %114 : vector<16x1xf32>
    %116 = vector.broadcast %108 : vector<16x1xf32> to vector<16x32xf32>
    %117 = arith.subf %100, %116 : vector<16x32xf32>
    %cst_73 = arith.constant 9.99999974E-6 : f32
    %118 = vector.broadcast %cst_73 : f32 to vector<16x1xf32>
    %119 = arith.addf %115, %118 : vector<16x1xf32>
    %120 = math.rsqrt %119 : vector<16x1xf32>
    %121 = vector.broadcast %120 : vector<16x1xf32> to vector<16x32xf32>
    %122 = arith.mulf %117, %121 : vector<16x32xf32>
    %123 = vector.broadcast %102 : vector<1x32xf32> to vector<16x32xf32>
    %124 = arith.mulf %122, %123 : vector<16x32xf32>
    %125 = vector.broadcast %104 : vector<1x32xf32> to vector<16x32xf32>
    %126 = arith.addf %124, %125 : vector<16x32xf32>
    %c0_74 = arith.constant 0 : index
    %c0_75 = arith.constant 0 : index
    %127 = vector.load %arg24[%c0_74, %c0_75] : memref<16x32xf32, #tpu.memory_space<vmem>>, vector<16x32xf32>
    tpu.vector_store %arg24[%c0_74, %c0_75], %126 {strides = array<i32>} : memref<16x32xf32, #tpu.memory_space<vmem>>, vector<16x32xf32>,
    %c1_i32 = arith.constant 1 : i32
    %128 = arith.cmpi eq, %arg0, %c1_i32 : i32
    %129 = arith.extui %128 : i1 to i32
    %c0_i32_76 = arith.constant 0 : i32
    %130 = arith.cmpi ne, %129, %c0_i32_76 : i32
    scf.if %130 {
      %131 = vector.shape_cast %126 : vector<16x32xf32> to vector<8x2x32xf32>
      %cst_77 = arith.constant dense<0.000000e+00> : vector<8x32xf32>
      %132 = vector.multi_reduction <add>, %131, %cst_77 [1] : vector<8x2x32xf32> to vector<8x32xf32>
      %cst_78 = arith.constant 2.000000e+00 : f32
      %133 = vector.broadcast %cst_78 : f32 to vector<8x32xf32>
      %134 = arith.divf %132, %133 : vector<8x32xf32>
      %c0_79 = arith.constant 0 : index
      %c0_80 = arith.constant 0 : index
      %135 = vector.load %arg21[%c0_79, %c0_80] : memref<32x128xf32, #tpu.memory_space<vmem>>, vector<32x128xf32>
      %cst_81 = arith.constant dense<0.000000e+00> : vector<8x128xf32>
      %136 = tpu.matmul %134, %135, %cst_81 {dimension_numbers = #tpu.dot_dimension_numbers<[1], [0], [0], [1], [0, 0, 1, 1], [], []>} : vector<8x32xf32>, vector<32x128xf32>, vector<8x128xf32> -> vector<8x128xf32>
      %c0_82 = arith.constant 0 : index
      %c0_83 = arith.constant 0 : index
      %137 = vector.load %arg22[%c0_82, %c0_83] : memref<1x128xf32, #tpu.memory_space<vmem>>, vector<1x128xf32>
      %138 = vector.broadcast %137 : vector<1x128xf32> to vector<8x128xf32>
      %139 = arith.addf %136, %138 : vector<8x128xf32>
      %c0_84 = arith.constant 0 : index
      %c0_85 = arith.constant 0 : index
      %140 = vector.load %arg23[%c0_84, %c0_85] : memref<8x128xf32, #tpu.memory_space<vmem>>, vector<8x128xf32>
      tpu.vector_store %arg23[%c0_84, %c0_85], %139 {strides = array<i32>} : memref<8x128xf32, #tpu.memory_space<vmem>>, vector<8x128xf32>,
    } else {
    }
    return
  }
  func.func @transform_0(%arg0: i32) -> (i32, i32, i32) {
    %c0_i32 = arith.constant 0 : i32
    %c0_i32_0 = arith.constant 0 : i32
    %c0_i32_1 = arith.constant 0 : i32
    %c0_i32_2 = arith.constant 0 : i32
    return %c0_i32, %c0_i32_0, %c0_i32_1 : i32, i32, i32
  }
  func.func @transform_1(%arg0: i32) -> (i32, i32, i32) {
    %c0_i32 = arith.constant 0 : i32
    %c0_i32_0 = arith.constant 0 : i32
    %c0_i32_1 = arith.constant 0 : i32
    %c0_i32_2 = arith.constant 0 : i32
    return %c0_i32, %c0_i32_0, %c0_i32_1 : i32, i32, i32
  }
  func.func @transform_2(%arg0: i32) -> (i32, i32) {
    %c0_i32 = arith.constant 0 : i32
    %c0_i32_0 = arith.constant 0 : i32
    %c0_i32_1 = arith.constant 0 : i32
    return %c0_i32, %c0_i32_0 : i32, i32
  }
  func.func @transform_3(%arg0: i32) -> (i32, i32) {
    %c0_i32 = arith.constant 0 : i32
    %c0_i32_0 = arith.constant 0 : i32
    %c0_i32_1 = arith.constant 0 : i32
    return %c0_i32, %c0_i32_0 : i32, i32
  }
  func.func @transform_4(%arg0: i32) -> (i32, i32, i32) {
    %c0_i32 = arith.constant 0 : i32
    %c0_i32_0 = arith.constant 0 : i32
    %c0_i32_1 = arith.constant 0 : i32
    return %arg0, %c0_i32, %c0_i32_0 : i32, i32, i32
  }
  func.func @transform_5(%arg0: i32) -> (i32, i32, i32) {
    %c0_i32 = arith.constant 0 : i32
    %c0_i32_0 = arith.constant 0 : i32
    %c0_i32_1 = arith.constant 0 : i32
    return %arg0, %c0_i32, %c0_i32_0 : i32, i32, i32
  }
  func.func @transform_6(%arg0: i32) -> (i32, i32, i32) {
    %c0_i32 = arith.constant 0 : i32
    %c0_i32_0 = arith.constant 0 : i32
    %c0_i32_1 = arith.constant 0 : i32
    return %arg0, %c0_i32, %c0_i32_0 : i32, i32, i32
  }
  func.func @transform_7(%arg0: i32) -> (i32, i32, i32) {
    %c0_i32 = arith.constant 0 : i32
    %c0_i32_0 = arith.constant 0 : i32
    %c0_i32_1 = arith.constant 0 : i32
    return %arg0, %c0_i32, %c0_i32_0 : i32, i32, i32
  }
  func.func @transform_8(%arg0: i32) -> (i32, i32, i32) {
    %c0_i32 = arith.constant 0 : i32
    %c0_i32_0 = arith.constant 0 : i32
    %c0_i32_1 = arith.constant 0 : i32
    return %arg0, %c0_i32, %c0_i32_0 : i32, i32, i32
  }
  func.func @transform_9(%arg0: i32) -> (i32, i32, i32) {
    %c0_i32 = arith.constant 0 : i32
    %c0_i32_0 = arith.constant 0 : i32
    %c0_i32_1 = arith.constant 0 : i32
    return %arg0, %c0_i32, %c0_i32_0 : i32, i32, i32
  }
  func.func @transform_10(%arg0: i32) -> (i32, i32, i32) {
    %c0_i32 = arith.constant 0 : i32
    %c0_i32_0 = arith.constant 0 : i32
    %c0_i32_1 = arith.constant 0 : i32
    return %arg0, %c0_i32, %c0_i32_0 : i32, i32, i32
  }
  func.func @transform_11(%arg0: i32) -> (i32, i32, i32) {
    %c0_i32 = arith.constant 0 : i32
    %c0_i32_0 = arith.constant 0 : i32
    %c0_i32_1 = arith.constant 0 : i32
    return %arg0, %c0_i32, %c0_i32_0 : i32, i32, i32
  }
  func.func @transform_12(%arg0: i32) -> (i32, i32, i32) {
    %c0_i32 = arith.constant 0 : i32
    %c0_i32_0 = arith.constant 0 : i32
    %c0_i32_1 = arith.constant 0 : i32
    return %arg0, %c0_i32, %c0_i32_0 : i32, i32, i32
  }
  func.func @transform_13(%arg0: i32) -> (i32, i32, i32) {
    %c0_i32 = arith.constant 0 : i32
    %c0_i32_0 = arith.constant 0 : i32
    %c0_i32_1 = arith.constant 0 : i32
    return %arg0, %c0_i32, %c0_i32_0 : i32, i32, i32
  }
  func.func @transform_14(%arg0: i32) -> (i32, i32, i32) {
    %c0_i32 = arith.constant 0 : i32
    %c0_i32_0 = arith.constant 0 : i32
    %c0_i32_1 = arith.constant 0 : i32
    return %arg0, %c0_i32, %c0_i32_0 : i32, i32, i32
  }
  func.func @transform_15(%arg0: i32) -> (i32, i32, i32) {
    %c0_i32 = arith.constant 0 : i32
    %c0_i32_0 = arith.constant 0 : i32
    %c0_i32_1 = arith.constant 0 : i32
    return %arg0, %c0_i32, %c0_i32_0 : i32, i32, i32
  }
  func.func @transform_16(%arg0: i32) -> (i32, i32, i32) {
    %c0_i32 = arith.constant 0 : i32
    %c0_i32_0 = arith.constant 0 : i32
    %c0_i32_1 = arith.constant 0 : i32
    return %arg0, %c0_i32, %c0_i32_0 : i32, i32, i32
  }
  func.func @transform_17(%arg0: i32) -> (i32, i32, i32) {
    %c0_i32 = arith.constant 0 : i32
    %c0_i32_0 = arith.constant 0 : i32
    %c0_i32_1 = arith.constant 0 : i32
    return %arg0, %c0_i32, %c0_i32_0 : i32, i32, i32
  }
  func.func @transform_18(%arg0: i32) -> (i32, i32, i32) {
    %c0_i32 = arith.constant 0 : i32
    %c0_i32_0 = arith.constant 0 : i32
    %c0_i32_1 = arith.constant 0 : i32
    return %arg0, %c0_i32, %c0_i32_0 : i32, i32, i32
  }
  func.func @transform_19(%arg0: i32) -> (i32, i32, i32) {
    %c0_i32 = arith.constant 0 : i32
    %c0_i32_0 = arith.constant 0 : i32
    %c0_i32_1 = arith.constant 0 : i32
    return %arg0, %c0_i32, %c0_i32_0 : i32, i32, i32
  }
  func.func @transform_20(%arg0: i32) -> (i32, i32) {
    %c0_i32 = arith.constant 0 : i32
    %c0_i32_0 = arith.constant 0 : i32
    %c0_i32_1 = arith.constant 0 : i32
    return %c0_i32, %c0_i32_0 : i32, i32
  }
  func.func @transform_21(%arg0: i32) -> (i32, i32) {
    %c0_i32 = arith.constant 0 : i32
    %c0_i32_0 = arith.constant 0 : i32
    %c0_i32_1 = arith.constant 0 : i32
    return %c0_i32, %c0_i32_0 : i32, i32
  }
  func.func @transform_22(%arg0: i32) -> (i32, i32) {
    %c0_i32 = arith.constant 0 : i32
    %c0_i32_0 = arith.constant 0 : i32
    %c0_i32_1 = arith.constant 0 : i32
    return %c0_i32, %c0_i32_0 : i32, i32
  }
}

</mosaic_0001>

<bundles_post_ra>
// kernel: tpu_custom_call.1
= control target key start
LH: loop header
LB: loop body
LE: loop exit
PB: predicated region body
PF: predicated region fallthrough
CT: control target
= control target key end

     0   :  { %s5439_s0 = inlined_call_operand.vmem [shape: f32[8,2,32], index: 0, kind: input, shape index: {}]   ;;  %s5440_s1 = inlined_call_operand.vmem [shape: f32[8,1,32], index: 1, kind: input, shape index: {}]   ;;  %s5441_s2 = inlined_call_operand.vmem [shape: f32[16,128], index: 2, kind: input, shape index: {}]   ;;  %s5442_s3 = inlined_call_operand.vmem [shape: bf16[128,32], index: 3, kind: input, shape index: {}]   ;;  %s5443_s4 = inlined_call_operand.vmem [shape: bf16[2,32,32], index: 4, kind: input, shape index: {}]   ;;  %s5444_s5 = inlined_call_operand.vmem [shape: f32[2,1,32], index: 5, kind: input, shape index: {}]   ;;  %s5445_s6 = inlined_call_operand.vmem [shape: bf16[2,32,32], index: 6, kind: input, shape index: {}]   ;;  %s5446_s7 = inlined_call_operand.vmem [shape: f32[2,1,32], index: 7, kind: input, shape index: {}]   ;;  %s5447_s8 = inlined_call_operand.vmem [shape: bf16[2,32,32], index: 8, kind: input, shape index: {}]   ;;  %s5448_s9 = inlined_call_operand.vmem [shape: f32[2,1,32], index: 9, kind: input, shape index: {}]   ;;  %s5449_s10 = inlined_call_operand.vmem [shape: bf16[2,32,32], index: 10, kind: input, shape index: {}]   ;;  %s5450_s11 = inlined_call_operand.vmem [shape: f32[2,1,32], index: 11, kind: input, shape index: {}]   ;;  %s5451_s12 = inlined_call_operand.vmem [shape: f32[2,1,32], index: 12, kind: input, shape index: {}]   ;;  %s5452_s13 = inlined_call_operand.vmem [shape: f32[2,1,32], index: 13, kind: input, shape index: {}]   ;;  %s5453_s14 = inlined_call_operand.vmem [shape: bf16[2,32,2048], index: 14, kind: input, shape index: {}]   ;;  %s5454_s15 = inlined_call_operand.vmem [shape: f32[2,1,2048], index: 15, kind: input, shape index: {}]   ;;  %s5455_s16 = inlined_call_operand.vmem [shape: bf16[2,2048,32], index: 16, kind: input, shape index: {}]   ;;  %s5456_s17 = inlined_call_operand.vmem [shape: f32[2,1,32], index: 17, kind: input, shape index: {}]   ;;  %s5457_s18 = inlined_call_operand.vmem [shape: f32[2,1,32], index: 18, kind: input, shape index: {}]   ;;  %s5458_s19 = inlined_call_operand.vmem [shape: f32[2,1,32], index: 19, kind: input, shape index: {}]   ;;  %s5459_s20 = inlined_call_operand.vmem [shape: f32[32,128], index: 20, kind: input, shape index: {}]   ;;  %s5460_s21 = inlined_call_operand.vmem [shape: f32[1,128], index: 21, kind: input, shape index: {}]   ;;  %s5461_s22 = inlined_call_operand.hbm [shape: f32[8,128], index: 22, kind: output, shape index: {}]  }
   0x1   :  { %5470 = sst [smem:[#allocation9_spill]] %s5439_s0 }
   0x2   :  { %5471 = sst [smem:[#allocation10_spill]] %s5440_s1 }
   0x3   :  { %5472 = sst [smem:[#allocation11_spill]] %s5441_s2 }
   0x4   :  { %5473 = sst [smem:[#allocation12_spill]] %s5442_s3 }
   0x5   :  { %5474 = sst [smem:[#allocation13_spill]] %s5443_s4 }
   0x6   :  { %5475 = sst [smem:[#allocation14_spill]] %s5444_s5 }
   0x7   :  { %5476 = sst [smem:[#allocation15_spill]] %s5445_s6 }
   0x8   :  { %5477 = sst [smem:[#allocation16_spill]] %s5447_s8 }
   0x9   :  { %5478 = sst [smem:[#allocation17_spill]] %s5449_s10 }
   0xa   :  { %5479 = sst [smem:[#allocation18_spill]] %s5453_s14 }
   0xb   :  { %5480 = sst [smem:[#allocation19_spill]] %s5454_s15 }
   0xc   :  { %5481 = sst [smem:[#allocation20_spill]] %s5458_s19 }
   0xd   :  { %5482 = sst [smem:[#allocation21_spill]] %s5459_s20 }
   0xe   :  { %5483 = sst [smem:[#allocation22_spill]] %s5460_s21 }
   0xf   :  { %5484 = sst [smem:[#allocation23_spill]] %s5461_s22 }
  0x10   :  { %27 = vsyncpa [#allocation4], 0  ;;  %s4747_s3 = smov 0  }
  0x11 LB: > { %5485 = sst [smem:[#allocation6_spill]] %s4627_s3  ;;  %s4753_s28 = sadd.s32 4294967295, %s4627_s3   ;;  %s4627_s3 = sphi %s4747_s3, %s33_s3  }
  0x12   : > { %5486 = sst [smem:[#allocation7_spill]] %s4753_s28  ;;  %p3606_p0 = scmp.ge.s32.totalorder %s4627_s3, 1 }
  0x13   : > { %p739_p1 = scmp.lt.s32.totalorder %s4627_s3, 3 }
  0x15   : > { %p740_p2 = pnand %p3606_p0, %p739_p1 }
  0x17   : > { %743 = sbr.rel (%p740_p2) target bundleno = 1941 (0x795), region = 108 }
  0x1c   : > { %p852_p3 = scmp.lt.s32.totalorder %s4753_s28, 1  ;;  %s5488_s6 = sld [smem:[#allocation13_spill]] }
  0x1d   : > { %s5489_s27 = sld [smem:[#allocation15_spill]] }
  0x1e   : > { %s4759_s29 = scalar_select %p852_p3, %s4753_s28, 1 }
  0x1f   : > { %s5490_s8 = sld [smem:[#allocation16_spill]] }
  0x20   : > { %s4352_s30 = sshll.u32 %s4759_s29, 4  ;;  %s5492_s10 = sld [smem:[#allocation17_spill]] }
  0x21   : > { %s5493_s14 = sld [smem:[#allocation18_spill]]  ;;  %s4357_s2 = sshll.u32 %s4759_s29, 10 }
  0x22   : > { %s4769_s25 = scalar_lea.vmem %s5488_s6, %s4352_s30  ;;  %s5494_s15 = sld [smem:[#allocation19_spill]] }
  0x23   : > { %s4774_s3 = scalar_lea.vmem %s5489_s27, %s4352_s30  ;;  %s4825_s19 = scalar_lea.vmem %s5455_s16, %s4357_s2 }
  0x25   : > { %s4783_s4 = scalar_lea.vmem %s5490_s8, %s4352_s30 }
  0x26   : > { %5491 = sst [smem:[#allocation8_spill]] %s4783_s4  ;;  %s4792_s26 = scalar_lea.vmem %s5492_s10, %s4352_s30 }
  0x27   : > { %s4356_s4 = sshll.u32 %s4759_s29, 8 }
  0x28   : > { %s4810_s5 = scalar_lea.vmem %s5493_s14, %s4356_s4  ;;  %s4815_s10 = scalar_lea.vmem %s5494_s15, %s4352_s30 }
  0x29   : > { %s909_s4 = scalar_lea.vmem %s5457_s18, %s4759_s29  ;;  %s5495_s14 = sld [smem:[#allocation20_spill]] }
  0x2a   : > { %s5496_s30 = sld [smem:[#allocation7_spill]] }
  0x2f   : > { %s912_s24 = scalar_lea.vmem %s5495_s14, %s4759_s29 }
  0x30   : > { %p3620_p4 = scmp.ne.s32.totalorder %s5496_s30, 0 }
  0x31   : > { %s5497_s1 = sld [smem:[#allocation9_spill]] (!%p3620_p4) }
  0x32   : > { %917 = sbr.rel (%p3620_p4) target bundleno = 75 (0x4b), region = 112  ;;  %s5498_s20 = sld [smem:[#allocation10_spill]] (!%p3620_p4) }
  0x37   : > { %v918_v0 = vld [vmem:[%s5497_s1] sm:$0x3]  ;;  %v919_v2 = vld [vmem:[%s5497_s1 + $0x2] sm:$0x3]  ;;  %v920_v5 = vld [vmem:[%s5497_s1 + $0x4] sm:$0x3] }
  0x38   : > { %v4551_v1 = vld [vmem:[%s5498_s20] ss:$0 sm:$0xff]  ;;  %v4552_v3 = vld [vmem:[%s5498_s20 + $0x1] ss:$0 sm:$0xff]  ;;  %v4553_v6 = vld [vmem:[%s5498_s20 + $0x2] ss:$0 sm:$0xff] }
  0x39   : > { %v958_v4 = vadd.f32 %v4551_v1, %v918_v0  ;;  %v959_v7 = vadd.f32 %v4552_v3, %v919_v2  ;;  %v921_v8 = vld [vmem:[%s5497_s1 + $0x6] sm:$0x3]  ;;  %v4554_v9 = vld [vmem:[%s5498_s20 + $0x3] ss:$0 sm:$0xff]  ;;  %v960_v10 = vadd.f32 %v4553_v6, %v920_v5  ;;  %v922_v11 = vld [vmem:[%s5497_s1 + $0x8] sm:$0x3] }
  0x3a   : > { %v961_v12 = vadd.f32 %v4554_v9, %v921_v8  ;;  %v4555_v13 = vld [vmem:[%s5498_s20 + $0x4] ss:$0 sm:$0xff]  ;;  %v923_v14 = vld [vmem:[%s5497_s1 + $0xa] sm:$0x3]  ;;  %v4556_v15 = vld [vmem:[%s5498_s20 + $0x5] ss:$0 sm:$0xff] }
  0x3b   : > { %974 = vst [vmem:[#allocation1] ss:$4 sm:$0xff] %v958_v4  ;;  %v962_v16 = vadd.f32 %v4555_v13, %v922_v11  ;;  %v924_v17 = vld [vmem:[%s5497_s1 + $0xc] sm:$0x3]  ;;  %v963_v18 = vadd.f32 %v4556_v15, %v923_v14  ;;  %v4557_v19 = vld [vmem:[%s5498_s20 + $0x6] ss:$0 sm:$0xff] }
  0x3c   : > { %976 = vst [vmem:[#allocation1 + $0x1] ss:$4 sm:$0xff] %v959_v7  ;;  %v925_v20 = vld [vmem:[%s5497_s1 + $0xe] sm:$0x3]  ;;  %v4558_v21 = vld [vmem:[%s5498_s20 + $0x7] ss:$0 sm:$0xff]  ;;  %v964_v22 = vadd.f32 %v4557_v19, %v924_v17 }
  0x3d   : > { %978 = vst [vmem:[#allocation1 + $0x2] ss:$4 sm:$0xff] %v960_v10  ;;  %v965_v23 = vadd.f32 %v4558_v21, %v925_v20  ;;  %vm993_vm0 = vcmask 261120  }
  0x3e   : > { %980 = vst [vmem:[#allocation1 + $0x3] ss:$4 sm:$0xff] %v961_v12 }
  0x3f   : > { %982 = vst [vmem:[#allocation1 + $0x20] ss:$4 sm:$0xff] %v962_v16 }
  0x40   : > { %984 = vst [vmem:[#allocation1 + $0x21] ss:$4 sm:$0xff] %v963_v18 }
  0x41   : > { %986 = vst [vmem:[#allocation1 + $0x22] ss:$4 sm:$0xff] %v964_v22 }
  0x42   : > { %988 = vst [vmem:[#allocation1 + $0x23] ss:$4 sm:$0xff] %v965_v23 }
  0x45   : > { %v989_v24 = vld.sshfl [vmem:[#allocation1] sm:$0xff pattern:$0x73625140] }
  0x46   : > { %994 = vst.msk [vmem:[#allocation2] sm:$0xff] %vm993_vm0, %v989_v24 }
  0x49   : > { %v990_v25 = vld.sshfl [vmem:[#allocation1 + $0x20] sm:$0xff pattern:$0x73625140] }
  0x4a   : > { %995 = vst.msk [vmem:[#allocation2 + $0x8] sm:$0xff] %vm993_vm0, %v990_v25 }
  0x4b PF: > { %v4361_v26 = vld [vmem:[%s4774_s3 + $0x8] sm:$0xff]  ;;  %v4360_v27 = vld [vmem:[%s4774_s3] sm:$0xff]  ;;  %vm1019_vm1 = vcmask 261120   ;;  %s5499_s0 = scalar_lea.vmem %s5446_s7, %s4759_s29  ;;  %s5500_s15 = sld [smem:[#allocation12_spill]] }
  0x4c   : > { %v4359_v30 = vld [vmem:[%s4769_s25 + $0x8] sm:$0xff]  ;;  %1063 = vmatpush.bf16.msra.mxu1 %v4361_v26  ;;  %v4358_v31 = vld [vmem:[%s4769_s25] sm:$0xff]  ;;  %s5501_s3 = sld [smem:[#allocation8_spill]]  ;;  %s5506_s28 = scalar_lea.vmem %s5450_s11, %s4759_s29 }
  0x4d   : > { %v4886_v28 = vld [vmem:[#allocation2] sm:$0xff]  ;;  %1029 = vmatpush.bf16.msra.mxu0 %v4359_v30  ;;  %v4559_v34 = vld [vmem:[%s5499_s0] ss:$0 sm:$0xff]  ;;  %s5502_s2 = sld [smem:[#allocation14_spill]]  ;;  %s5507_s14 = scalar_lea.vmem %s5451_s12, %s4759_s29 }
  0x4e   : > { %s5505_s25 = sld [smem:[#allocation11_spill]]  ;;  %s5508_s21 = scalar_lea.vmem %s5452_s13, %s4759_s29 }
  0x4f   : > { %s5509_s30 = scalar_lea.vmem %s5456_s17, %s4759_s29 }
  0x50   : > { %1064 = vmatpush.bf16.msra.mxu1 %v4360_v27 }
  0x51   : > { %v4888_v29 = vld [vmem:[#allocation2 + $0x8] sm:$0xff]  ;;  %1030 = vmatpush.bf16.msra.mxu0 %v4358_v31  ;;  %v4908_v40 = vld [vmem:[%s5500_s15 + $0x38] sm:$0xff]   ;;  %v4931_v57 = vld [vmem:[%s5500_s15 + $0x28] sm:$0xff]  }
  0x52   : > { %v4894_v32 = vpack.c.bf16 %v4888_v29, %v4886_v28  ;;  %v1145_v44 = vunpack.c.l.bf16 %v4908_v40  ;;  %v1146_v45 = vunpack.c.h.bf16 %v4908_v40  ;;  %v4915_v46 = vld [vmem:[%s5500_s15 + $0x30] sm:$0xff]   ;;  %v1141_v59 = vunpack.c.l.bf16 %v4931_v57  ;;  %v4943_v0 = vld [vmem:[%s5500_s15 + $0x20] sm:$0xff]   ;;  %v4955_v7 = vld [vmem:[%s5500_s15 + $0x18] sm:$0xff]  }
  0x53   : > { %v1143_v51 = vunpack.c.l.bf16 %v4915_v46  ;;  %v1144_v52 = vunpack.c.h.bf16 %v4915_v46  ;;  %v1142_v60 = vunpack.c.h.bf16 %v4931_v57  ;;  %v1139_v2 = vunpack.c.l.bf16 %v4943_v0  ;;  %v4967_v14 = vld [vmem:[%s5500_s15 + $0x10] sm:$0xff]   ;;  %v4363_v21 = vld [vmem:[%s5501_s3 + $0x8] sm:$0xff]  ;;  %v4362_v23 = vld [vmem:[%s5501_s3] sm:$0xff]  ;;  %s5503_s22 = scalar_lea.vmem %s5502_s2, %s4759_s29  ;;  %s5504_s3 = scalar_lea.vmem %s5448_s9, %s4759_s29 }
  0x54   : > { %3638 = vmatmul.msk.bf16.vlgmr.msra.gmra.mxu1 %vm1019_vm1, %v4894_v32  ;;  %3629 = vmatmul.msk.bf16.vlgmr.msra.gmra.mxu0 %vm1019_vm1, %v4894_v32  ;;  %v1140_v3 = vunpack.c.h.bf16 %v4943_v0  ;;  %v1137_v9 = vunpack.c.l.bf16 %v4955_v7  ;;  %v1138_v10 = vunpack.c.h.bf16 %v4955_v7  ;;  %v1135_v16 = vunpack.c.l.bf16 %v4967_v14  ;;  %v4980_v22 = vld [vmem:[%s5500_s15 + $0x8] sm:$0xff]  }
  0x55   : > { %v1136_v17 = vunpack.c.h.bf16 %v4967_v14  ;;  %1097 = vmatpush.bf16.msra.mxu2 %v4363_v21  ;;  %v1133_v25 = vunpack.c.l.bf16 %v4980_v22  ;;  %v1134_v26 = vunpack.c.h.bf16 %v4980_v22  ;;  %v4368_v14 = vld [vmem:[%s5500_s15 + $0x20] sm:$0xff]  ;;  %v4366_v22 = vld [vmem:[%s5500_s15 + $0x10] sm:$0xff] }
  0x59   : > { %1098 = vmatpush.bf16.msra.mxu2 %v4362_v23 }
  0x5c   : > { %3647 = vmatmul.msk.bf16.vlgmr.msra.gmra.mxu2 %vm1019_vm1, %v4894_v32  ;;  %v4560_v32 = vld [vmem:[%s5503_s22] ss:$0 sm:$0xff] }
  0xd1   : > { %v1066_v33 = vpop.f32.mrf.mxu1 }
  0xd2   : > { %v1067_v35 = vadd.f32 %v4559_v34, %v1066_v33  ;;  %v4993_v33 = vld [vmem:[%s5500_s15] sm:$0xff]  }
  0xd4   : > { %v1121_v37 = vpack.c.bf16 %v1067_v35, %v1067_v35  ;;  %v1131_v35 = vunpack.c.l.bf16 %v4993_v33 }
  0xd6   : > { %v1125_v41 = vunpack.c.l.b16 %v1121_v37  ;;  %v1032_v37 = vpop.f32.mrf.mxu0 }
  0xd9   : > { %v1068_v36 = vpop.f32.mrf.mxu1 }
  0xda   : > { %v1069_v38 = vadd.f32 %v4559_v34, %v1068_v36  ;;  %v1132_v36 = vunpack.c.h.bf16 %v4993_v33 }
  0xdc   : > { %v1122_v39 = vpack.c.bf16 %v1069_v38, %v1069_v38 }
  0xde   : > { %v1126_v42 = vunpack.c.l.b16 %v1122_v39 }
  0xe0   : > { %v1127_v43 = vpack.c.b16 %v1126_v42, %v1125_v41 }
  0xe2   : > { %v1129_v47 = vunpack.c.l.bf16 %v1127_v43  ;;  %v1130_v48 = vunpack.c.h.bf16 %v1127_v43  ;;  %v1034_v43 = vpop.f32.mrf.mxu0 }
  0xe4   : > { %v1161_v49 = vmul.f32 %v1145_v44, %v1129_v47  ;;  %v1162_v50 = vmul.f32 %v1146_v45, %v1130_v48  ;;  %v1159_v55 = vmul.f32 %v1143_v51, %v1129_v47  ;;  %v1160_v56 = vmul.f32 %v1144_v52, %v1130_v48 }
  0xe5   : > { %v1157_v62 = vmul.f32 %v1141_v59, %v1129_v47  ;;  %v1158_v63 = vmul.f32 %v1142_v60, %v1130_v48  ;;  %v1155_v5 = vmul.f32 %v1139_v2, %v1129_v47  ;;  %v1156_v6 = vmul.f32 %v1140_v3, %v1130_v48 }
  0xe6   : > { %v1170_v53 = vpack.c.bf16 %v1162_v50, %v1161_v49  ;;  %v1169_v58 = vpack.c.bf16 %v1160_v56, %v1159_v55  ;;  %v1153_v12 = vmul.f32 %v1137_v9, %v1129_v47  ;;  %v1154_v13 = vmul.f32 %v1138_v10, %v1130_v48 }
  0xe7   : > { %v1168_v1 = vpack.c.bf16 %v1158_v63, %v1157_v62  ;;  %v1167_v8 = vpack.c.bf16 %v1156_v6, %v1155_v5  ;;  %v1151_v19 = vmul.f32 %v1135_v16, %v1129_v47  ;;  %v1152_v20 = vmul.f32 %v1136_v17, %v1130_v48 }
  0xe8   : > { %v1233_v54 = vsel %vm1019_vm1, %v1170_v53, 0  ;;  %v1230_v61 = vsel %vm1019_vm1, %v1169_v58, 0  ;;  %v1166_v15 = vpack.c.bf16 %v1154_v13, %v1153_v12  ;;  %v1149_v30 = vmul.f32 %v1133_v25, %v1129_v47 }
  0xe9   : > { %1235 = vmatpush.bf16.xpose.msra.mxu3 %v1233_v54  ;;  %v1227_v4 = vsel %vm1019_vm1, %v1168_v1, 0  ;;  %v1224_v11 = vsel %vm1019_vm1, %v1167_v8, 0  ;;  %v1165_v24 = vpack.c.bf16 %v1152_v20, %v1151_v19  ;;  %v1150_v31 = vmul.f32 %v1134_v26, %v1130_v48  ;;  %v1206_v8 = vld [vmem:[%s5505_s25] sm:$0xff] }
  0xea   : > { %v1221_v18 = vsel %vm1019_vm1, %v1166_v15, 0  ;;  %v1147_v39 = vmul.f32 %v1131_v35, %v1129_v47  ;;  %v1148_v41 = vmul.f32 %v1132_v36, %v1130_v48  ;;  %v1033_v50 = vadd.f32 %v4560_v32, %v1032_v37  ;;  %v4561_v47 = vld [vmem:[%s5504_s3] ss:$0 sm:$0xff]  ;;  %v1100_v48 = vpop.f32.mrf.mxu2 }
  0xeb   : > { %v1218_v27 = vsel %vm1019_vm1, %v1165_v24, 0  ;;  %v1164_v34 = vpack.c.bf16 %v1150_v31, %v1149_v30  ;;  %v1035_v53 = vadd.f32 %v4560_v32, %v1034_v43  ;;  %v1101_v55 = vadd.f32 %v4561_v47, %v1100_v48 }
  0xec   : > { %v1163_v42 = vpack.c.bf16 %v1148_v41, %v1147_v39 }
  0xed   : > { %v1215_v38 = vsel %vm1019_vm1, %v1164_v34, 0  ;;  %v1205_v54 = vpack.c.bf16 %v1035_v53, %v1033_v50  ;;  %v1171_v56 = vpack.c.bf16 %v1101_v55, %v1101_v55  ;;  %v4373_v50 = vld [vmem:[%s4792_s26 + $0x8] sm:$0xff]  ;;  %v4372_v53 = vld [vmem:[%s4792_s26] sm:$0xff] }
  0xee   : > { %v1212_v49 = vsel %vm1019_vm1, %v1163_v42, 0  ;;  %1370 = vmatpush.bf16.msrb.mxu2 %v4373_v50  ;;  %v4391_v50 = vld [vmem:[%s4810_s5 + $0x8c] sm:$0xf] }
  0xef   : > { %v1175_v62 = vunpack.c.l.b16 %v1171_v56 }
  0xf1   : > { %1236 = vmatpush.bf16.xpose.msra.mxu3 %v1230_v61 }
  0xf2   : > { %v1102_v58 = vpop.f32.mrf.mxu2  ;;  %1371 = vmatpush.bf16.msrb.mxu2 %v4372_v53 }
  0xf3   : > { %v1103_v61 = vadd.f32 %v4561_v47, %v1102_v58 }
  0xf5   : > { %v1172_v63 = vpack.c.bf16 %v1103_v61, %v1103_v61 }
  0xf7   : > { %v1176_v1 = vunpack.c.l.b16 %v1172_v63 }
  0xf9   : > { %1237 = vmatpush.bf16.xpose.msra.mxu3 %v1227_v4  ;;  %v1177_v4 = vpack.c.b16 %v1176_v1, %v1175_v62  ;;  %v4562_v1 = vld [vmem:[%s5506_s28] ss:$0 sm:$0xff] }
  0xfb   : > { %v1179_v5 = vunpack.c.l.bf16 %v1177_v4  ;;  %v1180_v6 = vunpack.c.h.bf16 %v1177_v4 }
  0xfd   : > { %v1196_v12 = vmul.f32 %v1180_v6, %v1146_v45  ;;  %v1193_v13 = vmul.f32 %v1179_v5, %v1143_v51  ;;  %v1194_v15 = vmul.f32 %v1180_v6, %v1144_v52  ;;  %v1191_v45 = vmul.f32 %v1179_v5, %v1141_v59  ;;  %v4369_v51 = vld [vmem:[%s5500_s15 + $0x28] sm:$0xff] }
  0xfe   : > { %v1192_v46 = vmul.f32 %v1180_v6, %v1142_v60  ;;  %v1207_v52 = vld [vmem:[%s5505_s25 + $0x8] sm:$0xff]  ;;  %v1189_v24 = vmul.f32 %v1179_v5, %v1139_v2  ;;  %v1190_v59 = vmul.f32 %v1180_v6, %v1140_v3  ;;  %v1187_v30 = vmul.f32 %v1179_v5, %v1137_v9 }
  0xff   : > { %v1203_v40 = vpack.c.bf16 %v1194_v15, %v1193_v13  ;;  %v1188_v31 = vmul.f32 %v1180_v6, %v1138_v10  ;;  %v1185_v2 = vmul.f32 %v1179_v5, %v1135_v16  ;;  %v1186_v0 = vmul.f32 %v1180_v6, %v1136_v17  ;;  %v4367_v17 = vld [vmem:[%s5500_s15 + $0x18] sm:$0xff] }
 0x100   : > { %v1202_v23 = vpack.c.bf16 %v1192_v46, %v1191_v45  ;;  %v1183_v37 = vmul.f32 %v1179_v5, %v1133_v25  ;;  %v1184_v9 = vmul.f32 %v1180_v6, %v1134_v26  ;;  %v1181_v10 = vmul.f32 %v1179_v5, %v1131_v35  ;;  %v4365_v25 = vld [vmem:[%s5500_s15 + $0x8] sm:$0xff]  ;;  %v4364_v26 = vld [vmem:[%s5500_s15] sm:$0xff] }
 0x101   : > { %1238 = vmatpush.bf16.xpose.msra.mxu3 %v1224_v11  ;;  %v1195_v11 = vmul.f32 %v1179_v5, %v1145_v44  ;;  %v4370_v44 = vld [vmem:[%s5500_s15 + $0x30] sm:$0xff]  ;;  %v1200_v34 = vpack.c.bf16 %v1188_v31, %v1187_v30  ;;  %v1199_v3 = vpack.c.bf16 %v1186_v0, %v1185_v2  ;;  %v4398_v2 = vld [vmem:[%s4810_s5 + $0xbc] sm:$0xf0] }
 0x102   : > { %v1198_v7 = vpack.c.bf16 %v1184_v9, %v1183_v37  ;;  %v3758_v37 = vld [vmem:[%s4810_s5 + $0xc0] sm:$0xf0]  ;;  %v3764_v9 = vld [vmem:[%s4810_s5 + $0x88] sm:$0xf] }
 0x103   : > { %v1204_v20 = vpack.c.bf16 %v1196_v12, %v1195_v11 }
 0x105   : > { %1260 = vmatpush.bf16.msrb.mxu0 %v1204_v20 }
 0x109   : > { %1239 = vmatpush.bf16.xpose.msra.mxu3 %v1221_v18  ;;  %v4371_v18 = vld [vmem:[%s5500_s15 + $0x38] sm:$0xff]  ;;  %1261 = vmatpush.bf16.msrb.mxu0 %v1203_v40 }
 0x10a   : > { %1322 = vmatpush.bf16.msrb.mxu1 %v4371_v18  ;;  %v4629_v18 = vmov 32.0  }
 0x10d   : > { %1262 = vmatpush.bf16.msrb.mxu0 %v1202_v23 }
 0x10e   : > { %1323 = vmatpush.bf16.msrb.mxu1 %v4370_v44 }
 0x111   : > { %1240 = vmatpush.bf16.xpose.msra.mxu3 %v1218_v27  ;;  %v1201_v27 = vpack.c.bf16 %v1190_v59, %v1189_v24 }
 0x112   : > { %1324 = vmatpush.bf16.msrb.mxu1 %v4369_v51 }
 0x113   : > { %1263 = vmatpush.bf16.msrb.mxu0 %v1201_v27 }
 0x116   : > { %1325 = vmatpush.bf16.msrb.mxu1 %v4368_v14 }
 0x117   : > { %1264 = vmatpush.bf16.msrb.mxu0 %v1200_v34  ;;  %v3756_v34 = vld [vmem:[%s4810_s5 + $0x80] sm:$0xf] }
 0x118   : > { %v3757_v0 = vor.u32 %v4398_v2, %v3756_v34 }
 0x119   : > { %1241 = vmatpush.bf16.xpose.msra.mxu3 %v1215_v38  ;;  %v1182_v38 = vmul.f32 %v1180_v6, %v1132_v36 }
 0x11a   : > { %1326 = vmatpush.bf16.msrb.mxu1 %v4367_v17  ;;  %1681 = vmatpush.bf16.msra.mxu2 %v3757_v0 }
 0x11b   : > { %1265 = vmatpush.bf16.msrb.mxu0 %v1199_v3  ;;  %v1197_v16 = vpack.c.bf16 %v1182_v38, %v1181_v10  ;;  %v4390_v3 = vld [vmem:[%s4810_s5 + $0x84] sm:$0xf]  ;;  %v4399_v10 = vld [vmem:[%s4810_s5 + $0xc4] sm:$0xf0]  ;;  %v4393_v38 = vld [vmem:[%s4810_s5 + $0x9c] sm:$0xf] }
 0x11c   : > { %v3765_v14 = vor.u32 %v4399_v10, %v3764_v9 }
 0x11e   : > { %1327 = vmatpush.bf16.msrb.mxu1 %v4366_v22  ;;  %v3692_v22 = vld [vmem:[%s4810_s5] sm:$0xf] }
 0x11f   : > { %1266 = vmatpush.bf16.msrb.mxu0 %v1198_v7  ;;  %v3761_v7 = vor.u32 %v4390_v3, %v3758_v37  ;;  %v4563_v3 = vld [vmem:[%s5507_s14] ss:$0 sm:$0xff] }
 0x121   : > { %1242 = vmatpush.bf16.xpose.msra.mxu3 %v1212_v49 }
 0x122   : > { %1328 = vmatpush.bf16.msrb.mxu1 %v4365_v25  ;;  %v4382_v25 = vld [vmem:[%s4810_s5 + $0x3c] sm:$0xf0] }
 0x123   : > { %1267 = vmatpush.bf16.msrb.mxu0 %v1197_v16  ;;  %v3782_v16 = vld [vmem:[%s4810_s5 + $0xd8] sm:$0xf0] }
 0x124   : > { %v3785_v17 = vor.u32 %v4393_v38, %v3782_v16 }
 0x126   : > { %1329 = vmatpush.bf16.msrb.mxu1 %v4364_v26  ;;  %v4374_v26 = vld [vmem:[%s4810_s5 + $0x4] sm:$0xf] }
 0x127   : > { %1695 = vmatpush.bf16.msra.mxu0 %v3761_v7  ;;  %v4564_v7 = vld [vmem:[%s5508_s21] ss:$0 sm:$0xff] }
 0x128   : > { %3648 = vmatmul.msk.bf16.vlgmr.msra.gmra.mxu3 %vm1019_vm1, %v1205_v54 }
 0x129   : > { %1779 = vmatpush.bf16.msrb.mxu3 %v3785_v17  ;;  %v3788_v17 = vld [vmem:[%s4810_s5 + $0xa0] sm:$0xf] }
 0x12a   : > { %1709 = vmatpush.bf16.msra.mxu1 %v3765_v14  ;;  %v3780_v14 = vld [vmem:[%s4810_s5 + $0x98] sm:$0xf] }
 0x1ab   : > { %v1244_v19 = vpop.f32.mrf.mxu3 }
 0x1ac   : > { %v1245_v21 = vadd.f32 %v1244_v19, %v1206_v8 }
 0x1ae   : > { %1249 = vmax.xlane.f32.xlu0 %v1245_v21 }
 0x1b3   : > { %v1246_v57 = vpop.f32.mrf.mxu3 }
 0x1b4   : > { %v1247_v60 = vadd.f32 %v1246_v57, %v1207_v52 }
 0x1b6   : > { %1251 = vmax.xlane.f32.xlu0 %v1247_v60 }
 0x221   : > { %v1250_v33 = vpop.xlane.xlu0 %1249 }
 0x222   : > { %v1253_v35 = vsub.f32 %v1245_v21, %v1250_v33  ;;  %v3693_v33 = vor.u32 %v4382_v25, %v3692_v22  ;;  %v4402_v22 = vld [vmem:[%s4810_s5 + $0xdc] sm:$0xf0]  ;;  %v4394_v25 = vld [vmem:[%s4810_s5 + $0xa4] sm:$0xf] }
 0x224   : > { %v1255_v36 = vmul.f32 1.442695, %v1253_v35  ;;  %v3694_v35 = vld [vmem:[%s4810_s5 + $0x40] sm:$0xf0]  ;;  %1682 = vmatpush.bf16.msra.mxu2 %v3693_v33 }
 0x226   : > { %4568 = vpow2.f32 %v1255_v36  ;;  %v3700_v36 = vld [vmem:[%s4810_s5 + $0x8] sm:$0xf] }
 0x229   : > { %v1252_v39 = vpop.xlane.xlu0 %1251 }
 0x22a   : > { %v1254_v41 = vsub.f32 %v1247_v60, %v1252_v39  ;;  %v4383_v39 = vld [vmem:[%s4810_s5 + $0x44] sm:$0xf0] }
 0x22c   : > { %v1257_v42 = vmul.f32 1.442695, %v1254_v41  ;;  %v4569_v32 = vpop.eup %4568 }
 0x22e   : > { %4570 = vpow2.f32 %v1257_v42  ;;  %v3697_v42 = vor.u32 %v4374_v26, %v3694_v35  ;;  %v3790_v35 = vld [vmem:[%s4810_s5 + $0xe0] sm:$0xf0] }
 0x230   : > { %1696 = vmatpush.bf16.msra.mxu0 %v3697_v42  ;;  %v3789_v42 = vor.u32 %v4402_v22, %v3788_v17  ;;  %v4434_v17 = vld [vmem:[%s4825_s19 + $0xe0] sm:$0xff]  ;;  %v4428_v22 = vld [vmem:[%s4825_s19 + $0xb0] sm:$0xff] }
 0x234   : > { %v4571_v43 = vpop.eup %4570 }
 0x235   : > { %v1259_v49 = vpack.c.bf16 %v4571_v43, %v4569_v32  ;;  %v3701_v32 = vor.u32 %v4383_v39, %v3700_v36  ;;  %v4377_v43 = vld [vmem:[%s4810_s5 + $0x1c] sm:$0xf] }
 0x236   : > { %v4397_v36 = vld [vmem:[%s4810_s5 + $0xbc] sm:$0xf] }
 0x237   : > { %1268 = vmatmul.bf16.vlgmr.msrb.gmra.mxu0 %v1259_v49  ;;  %1330 = vmatmul.bf16.vlgmr.msrb.gmra.mxu1 %v1259_v49  ;;  %v3718_v49 = vld [vmem:[%s4810_s5 + $0x58] sm:$0xf0] }
 0x238   : > { %1710 = vmatpush.bf16.msra.mxu1 %v3701_v32  ;;  %v3716_v32 = vld [vmem:[%s4810_s5 + $0x18] sm:$0xf] }
 0x2b4   : > { %v1331_v54 = vpop.f32.mrf.mxu1  ;;  %v1269_v47 = vpop.f32.mrf.mxu0 }
 0x2b5   : > { %4572 = vrcp.f32 %v1331_v54  ;;  %v3721_v54 = vor.u32 %v4377_v43, %v3718_v49  ;;  %v4385_v43 = vld [vmem:[%s4810_s5 + $0x54] sm:$0xf0]  ;;  %v3793_v49 = vor.u32 %v4394_v25, %v3790_v35  ;;  %v4416_v25 = vld [vmem:[%s4825_s19 + $0x50] sm:$0xff] }
 0x2b6   : > { %v4408_v35 = vld [vmem:[%s4825_s19 + $0x10] sm:$0xff] }
 0x2b7   : > { %1780 = vmatpush.bf16.msrb.mxu3 %v3721_v54  ;;  %v4386_v54 = vld [vmem:[%s4810_s5 + $0x5c] sm:$0xf0] }
 0x2bb   : > { %v4573_v55 = vpop.eup %4572 }
 0x2bc   : > { %v1333_v48 = vpop.f32.mrf.mxu1  ;;  %v1271_v58 = vpop.f32.mrf.mxu0  ;;  %v1338_v61 = vmul.f32 %v4573_v55, %v1269_v47  ;;  %v3766_v47 = vld [vmem:[%s4810_s5 + $0xc8] sm:$0xf0]  ;;  %v4400_v55 = vld [vmem:[%s4810_s5 + $0xcc] sm:$0xf0] }
 0x2bd   : > { %4574 = vrcp.f32 %v1333_v48  ;;  %v3772_v48 = vld [vmem:[%s4810_s5 + $0x90] sm:$0xf] }
 0x2be   : > { %4576 = vrcp.f32 %v4629_v18  ;;  %v4384_v18 = vld [vmem:[%s4810_s5 + $0x4c] sm:$0xf0] }
 0x2c3   : > { %v4575_v56 = vpop.eup %4574 }
 0x2c4   : > { %v1339_v62 = vmul.f32 %v4575_v56, %v1271_v58  ;;  %v4577_v19 = vpop.eup %4576  ;;  %v3769_v56 = vor.u32 %v4391_v50, %v3766_v47  ;;  %v3773_v58 = vor.u32 %v4400_v55, %v3772_v48  ;;  %v4378_v47 = vld [vmem:[%s4810_s5 + $0x24] sm:$0xf]  ;;  %v4381_v55 = vld [vmem:[%s4810_s5 + $0x3c] sm:$0xf] }
 0x2c5   : > { %v1389_v20 = vmul.f32 32.0, %v4577_v19  ;;  %vm1393_vm2 = vweird.f32 %v4577_v19  ;;  %v3726_v48 = vld [vmem:[%s4810_s5 + $0x60] sm:$0xf0] }
 0x2c6   : > { %v1340_v63 = vpack.c.bf16 %v1339_v62, %v1338_v61  ;;  %v4392_v61 = vld [vmem:[%s4810_s5 + $0x94] sm:$0xf]  ;;  %1737 = vmatpush.bf16.msrb.mxu0 %v3773_v58  ;;  %v3717_v58 = vor.u32 %v4385_v43, %v3716_v32  ;;  %v4426_v43 = vld [vmem:[%s4825_s19 + $0xa0] sm:$0xff] }
 0x2c7   : > { %v1390_v44 = vsub.f32 1.0, %v1389_v20  ;;  %v3774_v62 = vld [vmem:[%s4810_s5 + $0xd0] sm:$0xf0] }
 0x2c8   : > { %3689 = vmatmul.msk.bf16.vlgmr.msrb.gmra.mxu2 %vm1019_vm1, %v1340_v63  ;;  %v4395_v63 = vld [vmem:[%s4810_s5 + $0xac] sm:$0xf]  ;;  %v4432_v32 = vld [vmem:[%s4825_s19 + $0xd0] sm:$0xff] }
 0x2c9   : > { %v1391_v21 = vmul.f32 %v4577_v19, %v1390_v44  ;;  %1723 = vmatpush.bf16.msrb.mxu2 %v3769_v56  ;;  %v4376_v44 = vld [vmem:[%s4810_s5 + $0x14] sm:$0xf]  ;;  %v3750_v56 = vld [vmem:[%s4810_s5 + $0x78] sm:$0xf0] }
 0x2cb   : > { %v1392_v40 = vadd.f32 %v4577_v19, %v1391_v21  ;;  %v3710_v21 = vld [vmem:[%s4810_s5 + $0x50] sm:$0xf0] }
 0x2cd   : > { %v5090_v45 = vsel %vm1393_vm2, %v4577_v19, %v1392_v40 }
 0x34b   : > { %v1373_v4 = vpop.f32.mrf.mxu2 }
 0x34c   : > { %v1374_v5 = vadd.f32 %v4562_v1, %v1373_v4 }
 0x34e   : > { %v1378_v6 = vadd.f32 %v1374_v5, %v4886_v28  ;;  %v3777_v5 = vor.u32 %v4392_v61, %v3774_v62  ;;  %v3729_v62 = vor.u32 %v4378_v47, %v3726_v48  ;;  %v4425_v47 = vld [vmem:[%s4825_s19 + $0x98] sm:$0xff]  ;;  %v4452_v48 = vld [vmem:[%s4825_s19 + $0x170] sm:$0xff] }
 0x350   : > { %v1382_v8 = vsel %vm1019_vm1, %v1378_v6, 0.0  ;;  %1751 = vmatpush.bf16.msrb.mxu1 %v3777_v5  ;;  %v3804_v5 = vld [vmem:[%s4810_s5 + $0xb0] sm:$0xf] }
 0x351   : > { %1383 = vadd.xlane.f32.xlu1 %v1382_v8  ;;  %v4375_v8 = vld [vmem:[%s4810_s5 + $0xc] sm:$0xf] }
 0x353   : > { %v1375_v11 = vpop.f32.mrf.mxu2 }
 0x354   : > { %v1376_v12 = vadd.f32 %v4562_v1, %v1375_v11 }
 0x356   : > { %v1379_v13 = vadd.f32 %v1376_v12, %v4888_v29 }
 0x358   : > { %v1385_v15 = vsel %vm1019_vm1, %v1379_v13, 0.0 }
 0x359   : > { %1386 = vadd.xlane.f32.xlu1 %v1385_v15  ;;  %v3708_v15 = vld [vmem:[%s4810_s5 + $0x10] sm:$0xf] }
 0x35a   : > { %v3709_v20 = vor.u32 %v4384_v18, %v3708_v15  ;;  %v3732_v15 = vld [vmem:[%s4810_s5 + $0x28] sm:$0xf] }
 0x35c   : > { %1738 = vmatpush.bf16.msrb.mxu0 %v3709_v20  ;;  %v3740_v20 = vld [vmem:[%s4810_s5 + $0x30] sm:$0xf] }
 0x3c4   : > { %v1384_v28 = vpop.xlane.xlu1 %1383 }
 0x3c5   : > { %v1395_v46 = vmul.f32 %v5090_v45, %v1384_v28  ;;  %v3713_v28 = vor.u32 %v4376_v44, %v3710_v21  ;;  %v4388_v44 = vld [vmem:[%s4810_s5 + $0x6c] sm:$0xf0]  ;;  %v4380_v21 = vld [vmem:[%s4810_s5 + $0x34] sm:$0xf] }
 0x3c7   : > { %v5093_v51 = vsub.f32 %v1378_v6, %v1395_v46  ;;  %v3798_v6 = vld [vmem:[%s4810_s5 + $0xe8] sm:$0xf0]  ;;  %1752 = vmatpush.bf16.msrb.mxu1 %v3713_v28 }
 0x3c8   : > { %v3801_v12 = vor.u32 %v4395_v63, %v3798_v6  ;;  %v4379_v46 = vld [vmem:[%s4810_s5 + $0x2c] sm:$0xf]  ;;  %v3753_v63 = vor.u32 %v4381_v55, %v3750_v56  ;;  %v4404_v6 = vld [vmem:[%s4810_s5 + $0xec] sm:$0xf0] }
 0x3c9   : > { %v1399_v29 = vmul.f32 %v5093_v51, %v5093_v51  ;;  %v4444_v55 = vld [vmem:[%s4825_s19 + $0x130] sm:$0xff] }
 0x3ca   : > { %1835 = vmatpush.bf16.msra.mxu3 %v3801_v12  ;;  %v4424_v56 = vld [vmem:[%s4825_s19 + $0x90] sm:$0xff] }
 0x3cb   : > { %v1401_v52 = vsel %vm1019_vm1, %v1399_v29, 0.0  ;;  %v3734_v29 = vld [vmem:[%s4810_s5 + $0x68] sm:$0xf0] }
 0x3cc   : > { %1402 = vadd.xlane.f32.xlu2 %v1401_v52  ;;  %v1387_v23 = vpop.xlane.xlu1 %1386  ;;  %v3737_v52 = vor.u32 %v4379_v46, %v3734_v29  ;;  %v3741_v46 = vor.u32 %v4388_v44, %v3740_v20  ;;  %v4447_v20 = vld [vmem:[%s4825_s19 + $0x148] sm:$0xff]  ;;  %v4440_v44 = vld [vmem:[%s4825_s19 + $0x110] sm:$0xff] }
 0x3cd   : > { %v1396_v24 = vmul.f32 %v5090_v45, %v1387_v23 }
 0x3ce   : > { %1836 = vmatpush.bf16.msra.mxu3 %v3737_v52  ;;  %v3812_v52 = vld [vmem:[%s4810_s5 + $0xb8] sm:$0xf] }
 0x3cf   : > { %v5099_v59 = vsub.f32 %v1379_v13, %v1396_v24  ;;  %v3702_v13 = vld [vmem:[%s4810_s5 + $0x48] sm:$0xf0] }
 0x3d0   : > { %v3705_v19 = vor.u32 %v4375_v8, %v3702_v13  ;;  %v4396_v8 = vld [vmem:[%s4810_s5 + $0xb4] sm:$0xf]  ;;  %v3805_v13 = vor.u32 %v4404_v6, %v3804_v5  ;;  %v4449_v5 = vld [vmem:[%s4825_s19 + $0x158] sm:$0xff]  ;;  %v4431_v6 = vld [vmem:[%s4825_s19 + $0xc8] sm:$0xff] }
 0x3d1   : > { %v1400_v57 = vmul.f32 %v5099_v59, %v5099_v59 }
 0x3d2   : > { %1724 = vmatpush.bf16.msrb.mxu2 %v3705_v19  ;;  %v4387_v19 = vld [vmem:[%s4810_s5 + $0x64] sm:$0xf0] }
 0x3d3   : > { %v1404_v60 = vsel %vm1019_vm1, %v1400_v57, 0.0  ;;  %v3733_v28 = vor.u32 %v4387_v19, %v3732_v15  ;;  %v4441_v15 = vld [vmem:[%s4825_s19 + $0x118] sm:$0xff] }
 0x3d4   : > { %1405 = vadd.xlane.f32.xlu2 %v1404_v60  ;;  %v4469_v19 = vld [vmem:[%s4825_s19 + $0x1f8] sm:$0xff] }
 0x43f   : > { %v1403_v27 = vpop.xlane.xlu2 %1402 }
 0x440   : > { %v1407_v30 = vmul.f32 %v1403_v27, %v5090_v45 }
 0x442   : > { %v5105_v31 = vadd.f32 1e-05, %v1407_v30 }
 0x444   : > { %4578 = vrsqrt.f32 %v5105_v31  ;;  %vm1417_vm4 = vweird.f32 %v5105_v31 }
 0x447   : > { %v1406_v41 = vpop.xlane.xlu2 %1405 }
 0x448   : > { %v1408_v53 = vmul.f32 %v1406_v41, %v5090_v45 }
 0x44a   : > { %v4579_v1 = vpop.eup %4578  ;;  %v1410_v4 = vadd.f32 1e-05, %v1408_v53  ;;  %v3724_v53 = vld [vmem:[%s4810_s5 + $0x20] sm:$0xf] }
 0x44b   : > { %v1412_v11 = vmul.f32 %v4579_v1, %v5105_v31  ;;  %vm1418_vm3 = vweird.f32 %v4579_v1  ;;  %v3725_v61 = vor.u32 %v4386_v54, %v3724_v53  ;;  %v4406_v53 = vld [vmem:[%s4825_s19] sm:$0xff]  ;;  %v4445_v54 = vld [vmem:[%s4825_s19 + $0x138] sm:$0xff] }
 0x44c   : > { %4580 = vrsqrt.f32 %v1410_v4  ;;  %vm1419_vm5 = vmor %vm1417_vm4, %vm1418_vm3  ;;  %vm1427_vm7 = vweird.f32 %v1410_v4 }
 0x44d   : > { %v1413_v40 = vmul.f32 %v4579_v1, %v1412_v11  ;;  %v3806_v11 = vld [vmem:[%s4810_s5 + $0xf0] sm:$0xf0] }
 0x44e   : > { %v3809_v18 = vor.u32 %v4396_v8, %v3806_v11  ;;  %v4442_v8 = vld [vmem:[%s4825_s19 + $0x120] sm:$0xff]  ;;  %v4459_v11 = vld [vmem:[%s4825_s19 + $0x1a8] sm:$0xff] }
 0x44f   : > { %v1414_v23 = vmul.f32 0.5, %v1413_v40  ;;  %v3742_v40 = vld [vmem:[%s4810_s5 + $0x70] sm:$0xf0] }
 0x450   : > { %v3745_v29 = vor.u32 %v4380_v21, %v3742_v40  ;;  %v4457_v21 = vld [vmem:[%s4825_s19 + $0x198] sm:$0xff]  ;;  %v4468_v40 = vld [vmem:[%s4825_s19 + $0x1f0] sm:$0xff] }
 0x451   : > { %v1415_v24 = vsub.f32 1.5, %v1414_v23  ;;  %v4405_v23 = vld [vmem:[%s4810_s5 + $0xf4] sm:$0xf0] }
 0x452   : > { %v4581_v57 = vpop.eup %4580 }
 0x453   : > { %v1416_v60 = vmul.f32 %v4579_v1, %v1415_v24  ;;  %v1422_v27 = vmul.f32 %v4581_v57, %v1410_v4  ;;  %vm1428_vm6 = vweird.f32 %v4581_v57  ;;  %v4403_v4 = vld [vmem:[%s4810_s5 + $0xe4] sm:$0xf0]  ;;  %v3813_v24 = vor.u32 %v4405_v23, %v3812_v52  ;;  %v4438_v23 = vld [vmem:[%s4825_s19 + $0x100] sm:$0xff] }
 0x454   : > { %vm1429_vm8 = vmor %vm1427_vm7, %vm1428_vm6  ;;  %v4467_v52 = vld [vmem:[%s4825_s19 + $0x1e8] sm:$0xff] }
 0x455   : > { %v1423_v30 = vmul.f32 %v4581_v57, %v1422_v27  ;;  %v1420_v34 = vsel %vm1419_vm5, %v4579_v1, %v1416_v60  ;;  %v3796_v1 = vld [vmem:[%s4810_s5 + $0xa8] sm:$0xf]  ;;  %v4389_v60 = vld [vmem:[%s4810_s5 + $0x74] sm:$0xf0] }
 0x456   : > { %v1431_v37 = vmul.f32 %v1420_v34, %v5093_v51  ;;  %v4401_v51 = vld [vmem:[%s4810_s5 + $0xd4] sm:$0xf0]  ;;  %v3797_v12 = vor.u32 %v4403_v4, %v3796_v1  ;;  %v4443_v1 = vld [vmem:[%s4825_s19 + $0x128] sm:$0xff]  ;;  %v4460_v4 = vld [vmem:[%s4825_s19 + $0x1b0] sm:$0xff] }
 0x457   : > { %v1424_v2 = vmul.f32 0.5, %v1423_v30  ;;  %v3781_v41 = vor.u32 %v4401_v51, %v3780_v14  ;;  %v4421_v27 = vld [vmem:[%s4825_s19 + $0x78] sm:$0xff] }
 0x458   : > { %v1436_v10 = vmul.f32 %v4563_v3, %v1431_v37  ;;  %v4413_v30 = vld [vmem:[%s4825_s19 + $0x38] sm:$0xff]  ;;  %v4419_v37 = vld [vmem:[%s4825_s19 + $0x68] sm:$0xff] }
 0x459   : > { %v1425_v0 = vsub.f32 1.5, %v1424_v2  ;;  %v4420_v2 = vld [vmem:[%s4825_s19 + $0x70] sm:$0xff]  ;;  %v4417_v14 = vld [vmem:[%s4825_s19 + $0x58] sm:$0xff] }
 0x45a   : > { %v5160_v26 = vadd.f32 %v4564_v7, %v1436_v10  ;;  %v4410_v10 = vld [vmem:[%s4825_s19 + $0x20] sm:$0xff]  ;;  %v4409_v51 = vld [vmem:[%s4825_s19 + $0x18] sm:$0xff] }
 0x45b   : > { %v1426_v31 = vmul.f32 %v4581_v57, %v1425_v0  ;;  %v4412_v0 = vld [vmem:[%s4825_s19 + $0x30] sm:$0xff] }
 0x45d   : > { %v1430_v9 = vsel %vm1429_vm8, %v4581_v57, %v1426_v31  ;;  %v3748_v57 = vld [vmem:[%s4810_s5 + $0x38] sm:$0xf]  ;;  %v4411_v31 = vld [vmem:[%s4825_s19 + $0x28] sm:$0xff] }
 0x45e   : > { %v1432_v38 = vmul.f32 %v1430_v9, %v5099_v59  ;;  %v3814_v59 = vld [vmem:[%s4810_s5 + $0xf8] sm:$0xf0]  ;;  %v3749_v34 = vor.u32 %v4389_v60, %v3748_v57  ;;  %v4436_v9 = vld [vmem:[%s4825_s19 + $0xf0] sm:$0xff]  ;;  %v4466_v57 = vld [vmem:[%s4825_s19 + $0x1e0] sm:$0xff] }
 0x45f   : > { %v3817_v50 = vor.u32 %v4397_v36, %v3814_v59  ;;  %v4433_v36 = vld [vmem:[%s4825_s19 + $0xd8] sm:$0xff]  ;;  %v4427_v59 = vld [vmem:[%s4825_s19 + $0xa8] sm:$0xff]  ;;  %v4454_v60 = vld [vmem:[%s4825_s19 + $0x180] sm:$0xff] }
 0x460   : > { %v1437_v16 = vmul.f32 %v4563_v3, %v1432_v38  ;;  %v4437_v3 = vld [vmem:[%s4825_s19 + $0xf8] sm:$0xff]  ;;  %v4435_v38 = vld [vmem:[%s4825_s19 + $0xe8] sm:$0xff] }
 0x462   : > { %v5162_v33 = vadd.f32 %v4564_v7, %v1437_v16  ;;  %v4418_v7 = vld [vmem:[%s4825_s19 + $0x60] sm:$0xff]  ;;  %v4429_v16 = vld [vmem:[%s4825_s19 + $0xb8] sm:$0xff] }
 0x464   : > { %v5169_v39 = vpack.c.bf16 %v5162_v33, %v5160_v26 }
 0x466   : > { %3818 = vmatmul.msk.bf16.vlgmr.msra.gmra.mxu2 %vm1019_vm1, %v5169_v39  ;;  %3819 = vmatmul.msk.bf16.vlgmr.msra.gmra.mxu0 %vm1019_vm1, %v5169_v39 }
 0x467   : > { %3820 = vmatmul.msk.bf16.vlgmr.msra.gmra.mxu1 %vm1019_vm1, %v5169_v39  ;;  %3825 = vmatmul.msk.bf16.vlgmr.msrb.gmra.mxu3 %vm1019_vm1, %v5169_v39 }
 0x468   : > { %1765 = vmatpush.bf16.msra.mxu2 %v3781_v41  ;;  %1793 = vmatpush.bf16.msra.mxu0 %v3789_v42  ;;  %v4415_v41 = vld [vmem:[%s4825_s19 + $0x48] sm:$0xff] }
 0x469   : > { %1807 = vmatpush.bf16.msra.mxu1 %v3793_v49  ;;  %1891 = vmatpush.bf16.msrb.mxu3 %v3817_v50  ;;  %v4407_v42 = vld [vmem:[%s4825_s19 + $0x8] sm:$0xff]  ;;  %v4414_v49 = vld [vmem:[%s4825_s19 + $0x40] sm:$0xff]  ;;  %v4453_v50 = vld [vmem:[%s4825_s19 + $0x178] sm:$0xff] }
 0x46c   : > { %1766 = vmatpush.bf16.msra.mxu2 %v3717_v58  ;;  %1794 = vmatpush.bf16.msra.mxu0 %v3725_v61  ;;  %v4451_v58 = vld [vmem:[%s4825_s19 + $0x168] sm:$0xff] }
 0x46d   : > { %1808 = vmatpush.bf16.msra.mxu1 %v3729_v62  ;;  %1892 = vmatpush.bf16.msrb.mxu3 %v3753_v63  ;;  %v4423_v61 = vld [vmem:[%s4825_s19 + $0x88] sm:$0xff]  ;;  %v4450_v62 = vld [vmem:[%s4825_s19 + $0x160] sm:$0xff] }
 0x46e   : > { %v4422_v63 = vld [vmem:[%s4825_s19 + $0x80] sm:$0xff] }
 0x476   : > { %3821 = vmatmul.msk.bf16.vlgmr.msrb.gmra.mxu2 %vm1019_vm1, %v5169_v39  ;;  %3822 = vmatmul.msk.bf16.vlgmr.msrb.gmra.mxu0 %vm1019_vm1, %v5169_v39 }
 0x477   : > { %3823 = vmatmul.msk.bf16.vlgmr.msrb.gmra.mxu1 %vm1019_vm1, %v5169_v39  ;;  %3829 = vmatmul.msk.bf16.vlgmr.msra.gmra.mxu3 %vm1019_vm1, %v5169_v39 }
 0x478   : > { %1821 = vmatpush.bf16.msrb.mxu2 %v3797_v12  ;;  %1849 = vmatpush.bf16.msrb.mxu0 %v3805_v13  ;;  %v4448_v12 = vld [vmem:[%s4825_s19 + $0x150] sm:$0xff]  ;;  %v4430_v13 = vld [vmem:[%s4825_s19 + $0xc0] sm:$0xff] }
 0x479   : > { %1863 = vmatpush.bf16.msrb.mxu1 %v3809_v18  ;;  %3017 = vmatpush.bf16.msra.mxu3 %v4437_v3  ;;  %v4458_v18 = vld [vmem:[%s4825_s19 + $0x1a0] sm:$0xff] }
 0x47c   : > { %1822 = vmatpush.bf16.msrb.mxu2 %v3733_v28  ;;  %1850 = vmatpush.bf16.msrb.mxu0 %v3741_v46  ;;  %v4446_v28 = vld [vmem:[%s4825_s19 + $0x140] sm:$0xff]  ;;  %v4439_v46 = vld [vmem:[%s4825_s19 + $0x108] sm:$0xff] }
 0x47d   : > { %1864 = vmatpush.bf16.msrb.mxu1 %v3745_v29  ;;  %3018 = vmatpush.bf16.msra.mxu3 %v4436_v9  ;;  %v4456_v29 = vld [vmem:[%s4825_s19 + $0x190] sm:$0xff] }
 0x481   : > { %3019 = vmatpush.bf16.msra.mxu3 %v4435_v38 }
 0x485   : > { %3020 = vmatpush.bf16.msra.mxu3 %v4434_v17 }
 0x486   : > { %3824 = vmatmul.msk.bf16.vlgmr.msra.gmra.mxu2 %vm1019_vm1, %v5169_v39  ;;  %3826 = vmatmul.msk.bf16.vlgmr.msra.gmra.mxu0 %vm1019_vm1, %v5169_v39 }
 0x487   : > { %3827 = vmatmul.msk.bf16.vlgmr.msra.gmra.mxu1 %vm1019_vm1, %v5169_v39  ;;  %3833 = vmatmul.msk.bf16.vlgmr.msrb.gmra.mxu3 %vm1019_vm1, %v5169_v39 }
 0x488   : > { %1877 = vmatpush.bf16.msra.mxu2 %v3813_v24  ;;  %2989 = vmatpush.bf16.msra.mxu1 %v4421_v27  ;;  %v4455_v24 = vld [vmem:[%s4825_s19 + $0x188] sm:$0xff]  ;;  %v4465_v27 = vld [vmem:[%s4825_s19 + $0x1d8] sm:$0xff] }
 0x489   : > { %2975 = vmatpush.bf16.msra.mxu0 %v4413_v30  ;;  %3021 = vmatpush.bf16.msra.mxu3 %v4433_v36  ;;  %v4464_v30 = vld [vmem:[%s4825_s19 + $0x1d0] sm:$0xff] }
 0x48c   : > { %1878 = vmatpush.bf16.msra.mxu2 %v3749_v34  ;;  %2990 = vmatpush.bf16.msra.mxu1 %v4420_v2  ;;  %v5290_v34 = vld [vmem:[%s4815_s10] sm:$0xff] }
 0x48d   : > { %2976 = vmatpush.bf16.msra.mxu0 %v4412_v0  ;;  %3022 = vmatpush.bf16.msra.mxu3 %v4432_v32  ;;  %v1481_v3 = vperm.slane %v5290_v34, 1 }
 0x490   : > { %2991 = vmatpush.bf16.msra.mxu1 %v4419_v37  ;;  %v1482_v37 = vperm.slane %v5290_v34, 2 }
 0x491   : > { %2977 = vmatpush.bf16.msra.mxu0 %v4411_v31  ;;  %3023 = vmatpush.bf16.msra.mxu3 %v4431_v6  ;;  %v4463_v31 = vld [vmem:[%s4825_s19 + $0x1c8] sm:$0xff] }
 0x494   : > { %2992 = vmatpush.bf16.msra.mxu1 %v4418_v7 }
 0x495   : > { %2978 = vmatpush.bf16.msra.mxu0 %v4410_v10  ;;  %3024 = vmatpush.bf16.msra.mxu3 %v4430_v13  ;;  %v4462_v10 = vld [vmem:[%s4825_s19 + $0x1c0] sm:$0xff] }
 0x496   : > { %3828 = vmatmul.msk.bf16.vlgmr.msrb.gmra.mxu2 %vm1019_vm1, %v5169_v39  ;;  %3830 = vmatmul.msk.bf16.vlgmr.msrb.gmra.mxu0 %vm1019_vm1, %v5169_v39 }
 0x497   : > { %3831 = vmatmul.msk.bf16.vlgmr.msrb.gmra.mxu1 %vm1019_vm1, %v5169_v39  ;;  %3003 = vmatpush.bf16.msrb.mxu2 %v4429_v16 }
 0x498   : > { %2993 = vmatpush.bf16.msra.mxu1 %v4417_v14  ;;  %v1480_v14 = vperm.slane %v5290_v34, 0 }
 0x499   : > { %2979 = vmatpush.bf16.msra.mxu0 %v4409_v51  ;;  %3073 = vmatpush.bf16.msrb.mxu3 %v4469_v19 }
 0x49b   : > { %3004 = vmatpush.bf16.msrb.mxu2 %v4428_v22 }
 0x49c   : > { %2994 = vmatpush.bf16.msra.mxu1 %v4416_v25 }
 0x49d   : > { %2980 = vmatpush.bf16.msra.mxu0 %v4408_v35  ;;  %3074 = vmatpush.bf16.msrb.mxu3 %v4468_v40 }
 0x49f   : > { %3005 = vmatpush.bf16.msrb.mxu2 %v4427_v59 }
 0x4a0   : > { %2995 = vmatpush.bf16.msra.mxu1 %v4415_v41  ;;  %v4485_v41 = vld [vmem:[%s4825_s19 + $0x278] sm:$0xff] }
 0x4a1   : > { %2981 = vmatpush.bf16.msra.mxu0 %v4407_v42  ;;  %3075 = vmatpush.bf16.msrb.mxu3 %v4467_v52  ;;  %v4489_v52 = vld [vmem:[%s4825_s19 + $0x298] sm:$0xff] }
 0x4a3   : > { %3006 = vmatpush.bf16.msrb.mxu2 %v4426_v43  ;;  %v4493_v43 = vld [vmem:[%s4825_s19 + $0x2b8] sm:$0xff] }
 0x4a4   : > { %2996 = vmatpush.bf16.msra.mxu1 %v4414_v49 }
 0x4a5   : > { %2982 = vmatpush.bf16.msra.mxu0 %v4406_v53  ;;  %3076 = vmatpush.bf16.msrb.mxu3 %v4466_v57 }
 0x4a6   : > { %3832 = vmatmul.msk.bf16.vlgmr.msra.gmra.mxu2 %vm1019_vm1, %v5169_v39  ;;  %v4461_v39 = vld [vmem:[%s4825_s19 + $0x1b8] sm:$0xff] }
 0x4a7   : > { %3007 = vmatpush.bf16.msrb.mxu2 %v4425_v47  ;;  %v4484_v47 = vld [vmem:[%s4825_s19 + $0x270] sm:$0xff] }
 0x4a8   : > { %3045 = vmatpush.bf16.msrb.mxu1 %v4453_v50 }
 0x4a9   : > { %3031 = vmatpush.bf16.msrb.mxu0 %v4445_v54  ;;  %3077 = vmatpush.bf16.msrb.mxu3 %v4465_v27 }
 0x4ab   : > { %3008 = vmatpush.bf16.msrb.mxu2 %v4424_v56 }
 0x4ac   : > { %3046 = vmatpush.bf16.msrb.mxu1 %v4452_v48 }
 0x4ad   : > { %3032 = vmatpush.bf16.msrb.mxu0 %v4444_v55  ;;  %3078 = vmatpush.bf16.msrb.mxu3 %v4464_v30 }
 0x4af   : > { %3009 = vmatpush.bf16.msrb.mxu2 %v4423_v61  ;;  %v4477_v61 = vld [vmem:[%s4825_s19 + $0x238] sm:$0xff] }
 0x4b0   : > { %3047 = vmatpush.bf16.msrb.mxu1 %v4451_v58  ;;  %v4492_v58 = vld [vmem:[%s4825_s19 + $0x2b0] sm:$0xff] }
 0x4b1   : > { %3033 = vmatpush.bf16.msrb.mxu0 %v4443_v1  ;;  %3079 = vmatpush.bf16.msrb.mxu3 %v4463_v31  ;;  %v4491_v1 = vld [vmem:[%s4825_s19 + $0x2a8] sm:$0xff]  ;;  %v4480_v31 = vld [vmem:[%s4825_s19 + $0x250] sm:$0xff] }
 0x4b3   : > { %3010 = vmatpush.bf16.msrb.mxu2 %v4422_v63  ;;  %v1485_v63 = vperm.slane %v5290_v34, 5 }
 0x4b4   : > { %3048 = vmatpush.bf16.msrb.mxu1 %v4450_v62 }
 0x4b5   : > { %3034 = vmatpush.bf16.msrb.mxu0 %v4442_v8  ;;  %3080 = vmatpush.bf16.msrb.mxu3 %v4462_v10  ;;  %v5319_v10 = vld [vmem:[%s4815_s10 + $0x8] sm:$0xff] }
 0x4b7   : > { %3059 = vmatpush.bf16.msra.mxu2 %v4461_v39  ;;  %v4483_v39 = vld [vmem:[%s4825_s19 + $0x268] sm:$0xff] }
 0x4b8   : > { %3049 = vmatpush.bf16.msrb.mxu1 %v4449_v5  ;;  %v4476_v5 = vld [vmem:[%s4825_s19 + $0x230] sm:$0xff] }
 0x4b9   : > { %3035 = vmatpush.bf16.msrb.mxu0 %v4441_v15  ;;  %v4490_v15 = vld [vmem:[%s4825_s19 + $0x2a0] sm:$0xff] }
 0x4bb   : > { %3060 = vmatpush.bf16.msra.mxu2 %v4460_v4 }
 0x4bc   : > { %3050 = vmatpush.bf16.msrb.mxu1 %v4448_v12  ;;  %v1483_v12 = vperm.slane %v5290_v34, 3 }
 0x4bd   : > { %3036 = vmatpush.bf16.msrb.mxu0 %v4440_v44 }
 0x4bf   : > { %3061 = vmatpush.bf16.msra.mxu2 %v4459_v11  ;;  %v4482_v11 = vld [vmem:[%s4825_s19 + $0x260] sm:$0xff] }
 0x4c0   : > { %3051 = vmatpush.bf16.msrb.mxu1 %v4447_v20  ;;  %v4475_v20 = vld [vmem:[%s4825_s19 + $0x228] sm:$0xff] }
 0x4c1   : > { %3037 = vmatpush.bf16.msrb.mxu0 %v4439_v46 }
 0x4c3   : > { %3062 = vmatpush.bf16.msra.mxu2 %v4458_v18  ;;  %v1484_v18 = vperm.slane %v5290_v34, 4 }
 0x4c4   : > { %3052 = vmatpush.bf16.msrb.mxu1 %v4446_v28 }
 0x4c5   : > { %3038 = vmatpush.bf16.msrb.mxu0 %v4438_v23 }
 0x4c7   : > { %3063 = vmatpush.bf16.msra.mxu2 %v4457_v21 }
 0x4cb   : > { %3064 = vmatpush.bf16.msra.mxu2 %v4456_v29  ;;  %v4481_v29 = vld [vmem:[%s4825_s19 + $0x258] sm:$0xff] }
 0x4cf   : > { %3065 = vmatpush.bf16.msra.mxu2 %v4455_v24 }
 0x4d3   : > { %3066 = vmatpush.bf16.msra.mxu2 %v4454_v60  ;;  %v4474_v60 = vld [vmem:[%s4825_s19 + $0x220] sm:$0xff] }
 0x4e3   : > { %v1698_v2 = vpop.f32.mrf.mxu0 }
 0x4e4   : > { %v1712_v0 = vpop.f32.mrf.mxu1  ;;  %v1699_v7 = vadd.f32 %v1698_v2, %v1481_v3 }
 0x4e5   : > { %v1713_v38 = vadd.f32 %v1712_v0, %v1482_v37 }
 0x4e6   : > { %v1900_v25 = vmax.f32 %v1699_v7, 0.0  ;;  %v4501_v7 = vld [vmem:[%s4825_s19 + $0x2f8] sm:$0xff] }
 0x4e7   : > { %v1901_v36 = vmax.f32 %v1713_v38, 0.0 }
 0x4e9   : > { %v1684_v9 = vpop.f32.mrf.mxu2 }
 0x4ea   : > { %v1685_v42 = vadd.f32 %v1684_v9, %v1480_v14  ;;  %v5311_v44 = vpop.f32.mrf.mxu3 }
 0x4eb   : > { %v1700_v16 = vpop.f32.mrf.mxu0 }
 0x4ec   : > { %v1701_v51 = vadd.f32 %v1700_v16, %v1481_v3  ;;  %v1714_v17 = vpop.f32.mrf.mxu1  ;;  %v1899_v48 = vmax.f32 %v1685_v42, 0.0  ;;  %v4473_v16 = vld [vmem:[%s4825_s19 + $0x218] sm:$0xff] }
 0x4ed   : > { %v1715_v22 = vadd.f32 %v1714_v17, %v1482_v37  ;;  %v1489_v17 = vperm.slane %v5319_v10, 1 }
 0x4ee   : > { %v1916_v35 = vmax.f32 %v1701_v51, 0.0 }
 0x4ef   : > { %v1917_v59 = vmax.f32 %v1715_v22, 0.0 }
 0x4f0   : > { %v1932_v32 = vpack.c.bf16 %v1916_v35, %v1900_v25  ;;  %v4479_v25 = vld [vmem:[%s4825_s19 + $0x248] sm:$0xff] }
 0x4f1   : > { %v1933_v49 = vpack.c.bf16 %v1917_v59, %v1901_v36  ;;  %v1686_v50 = vpop.f32.mrf.mxu2  ;;  %v4500_v36 = vld [vmem:[%s4825_s19 + $0x2f0] sm:$0xff] }
 0x4f2   : > { %v1687_v53 = vadd.f32 %v1686_v50, %v1480_v14  ;;  %2997 = vmatmul.bf16.vlgmr.msra.gmra.mxu1 %v1932_v32  ;;  %v4488_v14 = vld [vmem:[%s4825_s19 + $0x290] sm:$0xff]  ;;  %v1784_v22 = vpop.f32.mrf.mxu3  ;;  %v1487_v32 = vperm.slane %v5290_v34, 7 }
 0x4f3   : > { %3011 = vmatmul.bf16.vlgmr.msrb.gmra.mxu2 %v1933_v49  ;;  %3101 = vmatpush.bf16.msra.mxu1 %v4485_v41  ;;  %v1740_v54 = vpop.f32.mrf.mxu0  ;;  %v4472_v59 = vld [vmem:[%s4825_s19 + $0x210] sm:$0xff]  ;;  %v4487_v41 = vld [vmem:[%s4825_s19 + $0x288] sm:$0xff] }
 0x4f4   : > { %v1915_v55 = vmax.f32 %v1687_v53, 0.0  ;;  %v1754_v56 = vpop.f32.mrf.mxu1  ;;  %3115 = vmatpush.bf16.msrb.mxu2 %v4493_v43  ;;  %v1741_v23 = vadd.f32 %v1740_v54, %v1484_v18  ;;  %v1486_v43 = vperm.slane %v5290_v34, 6  ;;  %v4478_v53 = vld [vmem:[%s4825_s19 + $0x240] sm:$0xff]  ;;  %v1488_v54 = vperm.slane %v5319_v10, 0 }
 0x4f5   : > { %v1755_v6 = vadd.f32 %v1754_v56, %v1485_v63  ;;  %v1785_v56 = vadd.f32 %v1784_v22, %v1487_v32  ;;  %v4506_v22 = vld [vmem:[%s4825_s19 + $0x320] sm:$0xff] }
 0x4f6   : > { %v1931_v62 = vpack.c.bf16 %v1915_v55, %v1899_v48  ;;  %v1903_v9 = vmax.f32 %v1741_v23, 0.0  ;;  %v4517_v48 = vld [vmem:[%s4825_s19 + $0x378] sm:$0xff]  ;;  %v4499_v55 = vld [vmem:[%s4825_s19 + $0x2e8] sm:$0xff] }
 0x4f7   : > { %3102 = vmatpush.bf16.msra.mxu1 %v4484_v47  ;;  %v1904_v21 = vmax.f32 %v1755_v6, 0.0  ;;  %v4497_v23 = vld [vmem:[%s4825_s19 + $0x2d8] sm:$0xff] }
 0x4f8   : > { %2983 = vmatmul.bf16.vlgmr.msra.gmra.mxu0 %v1931_v62  ;;  %3116 = vmatpush.bf16.msrb.mxu2 %v4492_v58  ;;  %v4471_v58 = vld [vmem:[%s4825_s19 + $0x208] sm:$0xff] }
 0x4f9   : > { %3087 = vmatpush.bf16.msra.mxu0 %v4477_v61  ;;  %v1726_v4 = vpop.f32.mrf.mxu2  ;;  %v4486_v61 = vld [vmem:[%s4825_s19 + $0x280] sm:$0xff] }
 0x4fa   : > { %v1727_v46 = vadd.f32 %v1726_v4, %v1483_v12 }
 0x4fb   : > { %3103 = vmatpush.bf16.msra.mxu1 %v4483_v39  ;;  %v1742_v8 = vpop.f32.mrf.mxu0  ;;  %v1783_v39 = vadd.f32 %v5311_v44, %v1487_v32  ;;  %v4522_v32 = vld [vmem:[%s4825_s19 + $0x3a0] sm:$0xff] }
 0x4fc   : > { %v1756_v13 = vpop.f32.mrf.mxu1  ;;  %3117 = vmatpush.bf16.msrb.mxu2 %v4491_v1  ;;  %v1743_v40 = vadd.f32 %v1742_v8, %v1484_v18  ;;  %v1902_v0 = vmax.f32 %v1727_v46, 0.0  ;;  %v4516_v8 = vld [vmem:[%s4825_s19 + $0x370] sm:$0xff]  ;;  %v4470_v18 = vld [vmem:[%s4825_s19 + $0x200] sm:$0xff]  ;;  %v4515_v46 = vld [vmem:[%s4825_s19 + $0x368] sm:$0xff] }
 0x4fd   : > { %v1757_v19 = vadd.f32 %v1756_v13, %v1485_v63  ;;  %3088 = vmatpush.bf16.msra.mxu0 %v4476_v5  ;;  %v1838_v13 = vpop.f32.mrf.mxu3  ;;  %v1906_v44 = vmax.f32 %v1783_v39, 0.0  ;;  %v4532_v39 = vld [vmem:[%s4825_s19 + $0x3f0] sm:$0xff] }
 0x4fe   : > { %v1919_v30 = vmax.f32 %v1743_v40, 0.0 }
 0x4ff   : > { %v1920_v28 = vmax.f32 %v1757_v19, 0.0  ;;  %3104 = vmatpush.bf16.msra.mxu1 %v4482_v11  ;;  %v4498_v11 = vld [vmem:[%s4825_s19 + $0x2e0] sm:$0xff] }
 0x500   : > { %3118 = vmatpush.bf16.msrb.mxu2 %v4490_v15  ;;  %v1935_v51 = vpack.c.bf16 %v1919_v30, %v1903_v9  ;;  %v1490_v9 = vperm.slane %v5319_v10, 2 }
 0x501   : > { %v1936_v24 = vpack.c.bf16 %v1920_v28, %v1904_v21  ;;  %3089 = vmatpush.bf16.msra.mxu0 %v4475_v20  ;;  %v1728_v57 = vpop.f32.mrf.mxu2  ;;  %v4509_v20 = vld [vmem:[%s4825_s19 + $0x338] sm:$0xff] }
 0x502   : > { %v1729_v27 = vadd.f32 %v1728_v57, %v1483_v12  ;;  %v1922_v12 = vmax.f32 %v1785_v56, 0.0  ;;  %v4511_v56 = vld [vmem:[%s4825_s19 + $0x348] sm:$0xff] }
 0x503   : > { %3053 = vmatmul.bf16.vlgmr.msrb.gmra.mxu1 %v1936_v24  ;;  %v1796_v2 = vpop.f32.mrf.mxu0  ;;  %v4525_v24 = vld [vmem:[%s4825_s19 + $0x3b8] sm:$0xff] }
 0x504   : > { %v1918_v3 = vmax.f32 %v1729_v27, 0.0  ;;  %3105 = vmatpush.bf16.msra.mxu1 %v4481_v29  ;;  %v1810_v37 = vpop.f32.mrf.mxu1  ;;  %3119 = vmatpush.bf16.msrb.mxu2 %v4489_v52  ;;  %v1797_v4 = vadd.f32 %v1796_v2, %v1488_v54  ;;  %v1938_v29 = vpack.c.bf16 %v1922_v12, %v1906_v44  ;;  %v4514_v2 = vld [vmem:[%s4825_s19 + $0x360] sm:$0xff]  ;;  %v4520_v12 = vld [vmem:[%s4825_s19 + $0x390] sm:$0xff] }
 0x505   : > { %3090 = vmatpush.bf16.msra.mxu0 %v4474_v60  ;;  %v1811_v42 = vadd.f32 %v1810_v37, %v1489_v17  ;;  %v4508_v60 = vld [vmem:[%s4825_s19 + $0x330] sm:$0xff]  ;;  %v4507_v37 = vld [vmem:[%s4825_s19 + $0x328] sm:$0xff] }
 0x506   : > { %v1934_v38 = vpack.c.bf16 %v1918_v3, %v1902_v0  ;;  %v1907_v28 = vmax.f32 %v1797_v4, 0.0  ;;  %v4496_v0 = vld [vmem:[%s4825_s19 + $0x2d0] sm:$0xff] }
 0x507   : > { %v1908_v62 = vmax.f32 %v1811_v42, 0.0  ;;  %v4524_v3 = vld [vmem:[%s4825_s19 + $0x3b0] sm:$0xff]  ;;  %v4494_v42 = vld [vmem:[%s4825_s19 + $0x2c0] sm:$0xff] }
 0x508   : > { %3106 = vmatpush.bf16.msra.mxu1 %v4480_v31  ;;  %3025 = vmatmul.bf16.vlgmr.msra.gmra.mxu3 %v1934_v38  ;;  %v1840_v31 = vpop.f32.mrf.mxu3  ;;  %v4513_v38 = vld [vmem:[%s4825_s19 + $0x358] sm:$0xff] }
 0x509   : > { %3039 = vmatmul.bf16.vlgmr.msrb.gmra.mxu0 %v1935_v51  ;;  %3129 = vmatpush.bf16.msra.mxu3 %v4501_v7  ;;  %v1768_v35 = vpop.f32.mrf.mxu2  ;;  %v1491_v7 = vperm.slane %v5319_v10, 3 }
 0x50a   : > { %3091 = vmatpush.bf16.msra.mxu0 %v4473_v16  ;;  %3120 = vmatpush.bf16.msrb.mxu2 %v4488_v14  ;;  %v1769_v1 = vadd.f32 %v1768_v35, %v1486_v43  ;;  %v4495_v16 = vld [vmem:[%s4825_s19 + $0x2c8] sm:$0xff] }
 0x50b   : > { %v1798_v49 = vpop.f32.mrf.mxu0  ;;  %v4523_v14 = vld [vmem:[%s4825_s19 + $0x3a8] sm:$0xff]  ;;  %v1841_v51 = vadd.f32 %v1840_v31, %v1491_v7  ;;  %v1839_v35 = vadd.f32 %v1838_v13, %v1491_v7  ;;  %v4528_v31 = vld [vmem:[%s4825_s19 + $0x3d0] sm:$0xff]  ;;  %v1495_v7 = vperm.slane %v5319_v10, 7 }
 0x50c   : > { %3107 = vmatpush.bf16.msra.mxu1 %v4479_v25  ;;  %v1812_v50 = vpop.f32.mrf.mxu1  ;;  %v1799_v63 = vadd.f32 %v1798_v49, %v1488_v54  ;;  %v1905_v21 = vmax.f32 %v1769_v1, 0.0  ;;  %v1493_v54 = vperm.slane %v5319_v10, 5  ;;  %v4503_v13 = vld [vmem:[%s4825_s19 + $0x308] sm:$0xff] }
 0x50d   : > { %v1813_v47 = vadd.f32 %v1812_v50, %v1489_v17  ;;  %3130 = vmatpush.bf16.msra.mxu3 %v4500_v36  ;;  %v4505_v50 = vld [vmem:[%s4825_s19 + $0x318] sm:$0xff] }
 0x50e   : > { %3092 = vmatpush.bf16.msra.mxu0 %v4472_v59  ;;  %3121 = vmatpush.bf16.msrb.mxu2 %v4487_v41  ;;  %v1923_v19 = vmax.f32 %v1799_v63, 0.0  ;;  %v4512_v59 = vld [vmem:[%s4825_s19 + $0x350] sm:$0xff] }
 0x50f   : > { %v1924_v34 = vmax.f32 %v1813_v47, 0.0 }
 0x510   : > { %3108 = vmatpush.bf16.msra.mxu1 %v4478_v53  ;;  %v1939_v57 = vpack.c.bf16 %v1923_v19, %v1907_v28  ;;  %v4533_v53 = vld [vmem:[%s4825_s19 + $0x3f8] sm:$0xff]  ;;  %v1894_v28 = vpop.f32.mrf.mxu3 }
 0x511   : > { %v1940_v5 = vpack.c.bf16 %v1924_v34, %v1908_v62  ;;  %3131 = vmatpush.bf16.msra.mxu3 %v4499_v55  ;;  %v1770_v6 = vpop.f32.mrf.mxu2  ;;  %v1910_v55 = vmax.f32 %v1839_v35, 0.0  ;;  %v4521_v62 = vld [vmem:[%s4825_s19 + $0x398] sm:$0xff]  ;;  %v4504_v34 = vld [vmem:[%s4825_s19 + $0x310] sm:$0xff] }
 0x512   : > { %3093 = vmatpush.bf16.msra.mxu0 %v4471_v58  ;;  %v1771_v15 = vadd.f32 %v1770_v6, %v1486_v43  ;;  %3122 = vmatpush.bf16.msrb.mxu2 %v4486_v61  ;;  %v1926_v43 = vmax.f32 %v1841_v51, 0.0  ;;  %v4510_v6 = vld [vmem:[%s4825_s19 + $0x340] sm:$0xff] }
 0x513   : > { %3109 = vmatmul.bf16.vlgmr.msra.gmra.mxu1 %v1940_v5  ;;  %v1852_v17 = vpop.f32.mrf.mxu0  ;;  %v4526_v51 = vld [vmem:[%s4825_s19 + $0x3c0] sm:$0xff] }
 0x514   : > { %3157 = vmatpush.bf16.msrb.mxu1 %v4517_v48  ;;  %v1921_v40 = vmax.f32 %v1771_v15, 0.0  ;;  %v1866_v27 = vpop.f32.mrf.mxu1  ;;  %v1942_v63 = vpack.c.bf16 %v1926_v43, %v1910_v55  ;;  %v4531_v15 = vld [vmem:[%s4825_s19 + $0x3e8] sm:$0xff] }
 0x515   : > { %3132 = vmatpush.bf16.msra.mxu3 %v4498_v11  ;;  %v1867_v1 = vadd.f32 %v1866_v27, %v1493_v54  ;;  %v4518_v27 = vld [vmem:[%s4825_s19 + $0x380] sm:$0xff] }
 0x516   : > { %v1937_v52 = vpack.c.bf16 %v1921_v40, %v1905_v21  ;;  %3094 = vmatpush.bf16.msra.mxu0 %v4470_v18  ;;  %v4519_v40 = vld [vmem:[%s4825_s19 + $0x388] sm:$0xff] }
 0x517   : > { %v1912_v18 = vmax.f32 %v1867_v1, 0.0 }
 0x518   : > { %3158 = vmatpush.bf16.msrb.mxu1 %v4516_v8  ;;  %3067 = vmatmul.bf16.vlgmr.msra.gmra.mxu2 %v1937_v52  ;;  %v1492_v8 = vperm.slane %v5319_v10, 4 }
 0x519   : > { %3081 = vmatmul.bf16.vlgmr.msrb.gmra.mxu3 %v1938_v29  ;;  %3095 = vmatmul.bf16.vlgmr.msra.gmra.mxu0 %v1939_v57  ;;  %v1824_v30 = vpop.f32.mrf.mxu2  ;;  %v4530_v29 = vld [vmem:[%s4825_s19 + $0x3e0] sm:$0xff] }
 0x51a   : > { %3143 = vmatpush.bf16.msrb.mxu0 %v4509_v20  ;;  %3133 = vmatpush.bf16.msra.mxu3 %v4497_v23  ;;  %v1825_v25 = vadd.f32 %v1824_v30, %v1490_v9  ;;  %v1494_v20 = vperm.slane %v5319_v10, 6  ;;  %v1853_v44 = vadd.f32 %v1852_v17, %v1492_v8  ;;  %v4529_v30 = vld [vmem:[%s4825_s19 + $0x3d8] sm:$0xff]  ;;  %v4565_v10 = vld [vmem:[%s5509_s30] ss:$0 sm:$0xff] }
 0x51b   : > { %3171 = vmatpush.bf16.msra.mxu2 %v4525_v24  ;;  %v1854_v4 = vpop.f32.mrf.mxu0 }
 0x51c   : > { %3159 = vmatpush.bf16.msrb.mxu1 %v4515_v46  ;;  %v1868_v49 = vpop.f32.mrf.mxu1  ;;  %v1909_v47 = vmax.f32 %v1825_v25, 0.0  ;;  %v1855_v19 = vadd.f32 %v1854_v4, %v1492_v8  ;;  %v4502_v46 = vld [vmem:[%s4825_s19 + $0x300] sm:$0xff]  ;;  %v1911_v57 = vmax.f32 %v1853_v44, 0.0 }
 0x51d   : > { %v1869_v58 = vadd.f32 %v1868_v49, %v1493_v54 }
 0x51e   : > { %3144 = vmatpush.bf16.msrb.mxu0 %v4508_v60  ;;  %3134 = vmatpush.bf16.msra.mxu3 %v4496_v0  ;;  %v1927_v52 = vmax.f32 %v1855_v19, 0.0 }
 0x51f   : > { %3172 = vmatpush.bf16.msra.mxu2 %v4524_v3  ;;  %v1928_v11 = vmax.f32 %v1869_v58, 0.0 }
 0x520   : > { %3160 = vmatpush.bf16.msrb.mxu1 %v4514_v2  ;;  %v1943_v2 = vpack.c.bf16 %v1927_v52, %v1911_v57 }
 0x521   : > { %v1826_v36 = vpop.f32.mrf.mxu2  ;;  %v1944_v21 = vpack.c.bf16 %v1928_v11, %v1912_v18 }
 0x522   : > { %3145 = vmatpush.bf16.msrb.mxu0 %v4507_v37  ;;  %3135 = vmatpush.bf16.msra.mxu3 %v4495_v16  ;;  %v1827_v41 = vadd.f32 %v1826_v36, %v1490_v9  ;;  %v1896_v9 = vpop.f32.mrf.mxu3 }
 0x523   : > { %3173 = vmatpush.bf16.msra.mxu2 %v4523_v14  ;;  %v1897_v16 = vadd.f32 %v1896_v9, %v1495_v7  ;;  %v1895_v14 = vadd.f32 %v1894_v28, %v1495_v7 }
 0x524   : > { %3161 = vmatpush.bf16.msrb.mxu1 %v4513_v38  ;;  %v1925_v48 = vmax.f32 %v1827_v41, 0.0  ;;  %v4527_v38 = vld [vmem:[%s4825_s19 + $0x3c8] sm:$0xff] }
 0x525   : > { %v1930_v17 = vmax.f32 %v1897_v16, 0.0 }
 0x526   : > { %3146 = vmatpush.bf16.msrb.mxu0 %v4506_v22  ;;  %v1941_v61 = vpack.c.bf16 %v1925_v48, %v1909_v47  ;;  %3136 = vmatpush.bf16.msra.mxu3 %v4494_v42  ;;  %v1914_v22 = vmax.f32 %v1895_v14, 0.0 }
 0x527   : > { %3174 = vmatpush.bf16.msra.mxu2 %v4522_v32 }
 0x528   : > { %3162 = vmatpush.bf16.msrb.mxu1 %v4512_v59  ;;  %3123 = vmatmul.bf16.vlgmr.msrb.gmra.mxu2 %v1941_v61  ;;  %v1946_v25 = vpack.c.bf16 %v1930_v17, %v1914_v22 }
 0x529   : > { %3137 = vmatmul.bf16.vlgmr.msra.gmra.mxu3 %v1942_v63  ;;  %v1880_v5 = vpop.f32.mrf.mxu2 }
 0x52a   : > { %3147 = vmatpush.bf16.msrb.mxu0 %v4505_v50  ;;  %3185 = vmatpush.bf16.msrb.mxu3 %v4533_v53  ;;  %v1881_v23 = vadd.f32 %v1880_v5, %v1494_v20 }
 0x52b   : > { %3175 = vmatpush.bf16.msra.mxu2 %v4521_v62 }
 0x52c   : > { %3163 = vmatpush.bf16.msrb.mxu1 %v4511_v56  ;;  %v1913_v0 = vmax.f32 %v1881_v23, 0.0 }
 0x52e   : > { %3148 = vmatpush.bf16.msrb.mxu0 %v4504_v34  ;;  %3186 = vmatpush.bf16.msrb.mxu3 %v4532_v39 }
 0x52f   : > { %3176 = vmatpush.bf16.msra.mxu2 %v4520_v12 }
 0x530   : > { %3164 = vmatpush.bf16.msrb.mxu1 %v4510_v6 }
 0x531   : > { %v1882_v24 = vpop.f32.mrf.mxu2 }
 0x532   : > { %3149 = vmatpush.bf16.msrb.mxu0 %v4503_v13  ;;  %3187 = vmatpush.bf16.msrb.mxu3 %v4531_v15  ;;  %v1883_v60 = vadd.f32 %v1882_v24, %v1494_v20 }
 0x533   : > { %3165 = vmatmul.bf16.vlgmr.msrb.gmra.mxu1 %v1944_v21  ;;  %3177 = vmatpush.bf16.msra.mxu2 %v4519_v40 }
 0x534   : > { %v1929_v3 = vmax.f32 %v1883_v60, 0.0 }
 0x536   : > { %3150 = vmatpush.bf16.msrb.mxu0 %v4502_v46  ;;  %3188 = vmatpush.bf16.msrb.mxu3 %v4530_v29  ;;  %v1945_v37 = vpack.c.bf16 %v1929_v3, %v1913_v0 }
 0x537   : > { %3178 = vmatpush.bf16.msra.mxu2 %v4518_v27 }
 0x539   : > { %3151 = vmatmul.bf16.vlgmr.msrb.gmra.mxu0 %v1943_v2 }
 0x53a   : > { %3189 = vmatpush.bf16.msrb.mxu3 %v4529_v30  ;;  %3179 = vmatmul.bf16.vlgmr.msra.gmra.mxu2 %v1945_v37 }
 0x53e   : > { %3190 = vmatpush.bf16.msrb.mxu3 %v4528_v31 }
 0x542   : > { %3191 = vmatpush.bf16.msrb.mxu3 %v4527_v38 }
 0x546   : > { %3192 = vmatpush.bf16.msrb.mxu3 %v4526_v51 }
 0x549   : > { %3193 = vmatmul.bf16.vlgmr.msrb.gmra.mxu3 %v1946_v25 }
 0x56f   : > { %v2998_v36 = vpop.f32.mrf.mxu1 }
 0x575   : > { %v2984_v35 = vpop.f32.mrf.mxu0 }
 0x576   : > { %v3012_v59 = vpop.f32.mrf.mxu2  ;;  %v2985_v53 = vadd.f32 %v4565_v10, %v2984_v35 }
 0x577   : > { %v3000_v32 = vpop.f32.mrf.mxu1 }
 0x578   : > { %v2999_v48 = vadd.f32 %v2998_v36, %v2985_v53 }
 0x57a   : > { %v3013_v56 = vadd.f32 %v3012_v59, %v2999_v48 }
 0x57d   : > { %v2986_v41 = vpop.f32.mrf.mxu0 }
 0x57e   : > { %v3014_v43 = vpop.f32.mrf.mxu2  ;;  %v2987_v58 = vadd.f32 %v4565_v10, %v2986_v41 }
 0x580   : > { %v3054_v47 = vpop.f32.mrf.mxu1  ;;  %v3001_v34 = vadd.f32 %v3000_v32, %v2987_v58 }
 0x582   : > { %v3015_v4 = vadd.f32 %v3014_v43, %v3001_v34 }
 0x586   : > { %v3040_v49 = vpop.f32.mrf.mxu0 }
 0x588   : > { %v3056_v39 = vpop.f32.mrf.mxu1 }
 0x58b   : > { %v3026_v42 = vpop.f32.mrf.mxu3 }
 0x58c   : > { %v3027_v62 = vadd.f32 %v3026_v42, %v3013_v56 }
 0x58e   : > { %v3042_v55 = vpop.f32.mrf.mxu0  ;;  %v3041_v1 = vadd.f32 %v3040_v49, %v3027_v62 }
 0x590   : > { %v3055_v8 = vadd.f32 %v3054_v47, %v3041_v1  ;;  %v3110_v18 = vpop.f32.mrf.mxu1 }
 0x593   : > { %v3028_v50 = vpop.f32.mrf.mxu3 }
 0x594   : > { %v3029_v6 = vadd.f32 %v3028_v50, %v3015_v4 }
 0x596   : > { %v3096_v5 = vpop.f32.mrf.mxu0  ;;  %v3043_v15 = vadd.f32 %v3042_v55, %v3029_v6 }
 0x598   : > { %v3057_v20 = vadd.f32 %v3056_v39, %v3043_v15  ;;  %v3112_v23 = vpop.f32.mrf.mxu1  ;;  %v4566_v15 = vld [vmem:[%s909_s4] ss:$0 sm:$0xff]  ;;  %s5511_s4 = sld [smem:[#allocation7_spill]] }
 0x59b   : > { %v3068_v54 = vpop.f32.mrf.mxu2 }
 0x59c   : > { %v3082_v61 = vpop.f32.mrf.mxu3  ;;  %v3069_v12 = vadd.f32 %v3068_v54, %v3055_v8 }
 0x59e   : > { %v3083_v19 = vadd.f32 %v3082_v61, %v3069_v12  ;;  %v3098_v44 = vpop.f32.mrf.mxu0  ;;  %p4346_p5 = scmp.ne.s32.totalorder %s5511_s4, 1 }
 0x59f   : > { %s5512_s8 = sld [smem:[#allocation21_spill]] (!%p4346_p5) }
 0x5a0   : > { %v3097_v21 = vadd.f32 %v3096_v5, %v3083_v19  ;;  %v4567_v19 = vld [vmem:[%s912_s24] ss:$0 sm:$0xff]  ;;  %s5513_s5 = sld [smem:[#allocation22_spill]] (!%p4346_p5) }
 0x5a2   : > { %v3111_v52 = vadd.f32 %v3110_v18, %v3097_v21 }
 0x5a3   : > { %v3070_v63 = vpop.f32.mrf.mxu2 }
 0x5a4   : > { %v3084_v11 = vpop.f32.mrf.mxu3  ;;  %v3071_v40 = vadd.f32 %v3070_v63, %v3057_v20 }
 0x5a6   : > { %v3085_v29 = vadd.f32 %v3084_v11, %v3071_v40 }
 0x5a8   : > { %v3099_v60 = vadd.f32 %v3098_v44, %v3085_v29 }
 0x5aa   : > { %v3113_v0 = vadd.f32 %v3112_v23, %v3099_v60 }
 0x5ab   : > { %v3124_v13 = vpop.f32.mrf.mxu2 }
 0x5ac   : > { %v3138_v28 = vpop.f32.mrf.mxu3  ;;  %v3125_v24 = vadd.f32 %v3124_v13, %v3111_v52 }
 0x5ae   : > { %v3139_v27 = vadd.f32 %v3138_v28, %v3125_v24 }
 0x5b0   : > { %v3166_v3 = vpop.f32.mrf.mxu1 }
 0x5b3   : > { %v3126_v46 = vpop.f32.mrf.mxu2 }
 0x5b4   : > { %v3140_v30 = vpop.f32.mrf.mxu3  ;;  %v3127_v31 = vadd.f32 %v3126_v46, %v3113_v0 }
 0x5b6   : > { %v3152_v57 = vpop.f32.mrf.mxu0  ;;  %v3141_v38 = vadd.f32 %v3140_v30, %v3127_v31 }
 0x5b7   : > { %v3153_v2 = vadd.f32 %v3152_v57, %v3139_v27 }
 0x5b8   : > { %v3168_v25 = vpop.f32.mrf.mxu1 }
 0x5b9   : > { %v3167_v9 = vadd.f32 %v3166_v3, %v3153_v2 }
 0x5bd   : > { %v3180_v37 = vpop.f32.mrf.mxu2 }
 0x5be   : > { %v3154_v7 = vpop.f32.mrf.mxu0  ;;  %v3181_v16 = vadd.f32 %v3180_v37, %v3167_v9 }
 0x5bf   : > { %v3155_v51 = vadd.f32 %v3154_v7, %v3141_v38 }
 0x5c1   : > { %v3169_v36 = vadd.f32 %v3168_v25, %v3155_v51 }
 0x5c5   : > { %v3182_v35 = vpop.f32.mrf.mxu2 }
 0x5c6   : > { %v3183_v41 = vadd.f32 %v3182_v35, %v3169_v36 }
 0x5cc   : > { %v3194_v14 = vpop.f32.mrf.mxu3 }
 0x5cd   : > { %v3195_v17 = vadd.f32 %v3194_v14, %v3181_v16 }
 0x5cf   : > { %v3199_v22 = vadd.f32 %v3195_v17, %v5160_v26 }
 0x5d1   : > { %v3203_v59 = vsel %vm1019_vm1, %v3199_v22, 0.0 }
 0x5d2   : > { %3204 = vadd.xlane.f32.xlu0 %v3203_v59 }
 0x5d4   : > { %v3196_v42 = vpop.f32.mrf.mxu3 }
 0x5d5   : > { %v3197_v32 = vadd.f32 %v3196_v42, %v3183_v41 }
 0x5d7   : > { %v3200_v43 = vadd.f32 %v3197_v32, %v5162_v33 }
 0x5d9   : > { %v3206_v10 = vsel %vm1019_vm1, %v3200_v43, 0.0 }
 0x5da   : > { %3207 = vadd.xlane.f32.xlu1 %v3206_v10 }
 0x645   : > { %v3205_v49 = vpop.xlane.xlu0 %3204 }
 0x646   : > { %v3209_v50 = vmul.f32 %v3205_v49, %v5090_v45 }
 0x648   : > { %v3211_v53 = vsub.f32 %v3199_v22, %v3209_v50 }
 0x64a   : > { %v3213_v54 = vmul.f32 %v3211_v53, %v3211_v53 }
 0x64c   : > { %v3215_v26 = vsel %vm1019_vm1, %v3213_v54, 0.0 }
 0x64d   : > { %v3208_v47 = vpop.xlane.xlu1 %3207  ;;  %3216 = vadd.xlane.f32.xlu2 %v3215_v26 }
 0x64e   : > { %v3210_v48 = vmul.f32 %v3208_v47, %v5090_v45 }
 0x650   : > { %v3212_v55 = vsub.f32 %v3200_v43, %v3210_v48 }
 0x652   : > { %v3214_v56 = vmul.f32 %v3212_v55, %v3212_v55 }
 0x654   : > { %v3218_v58 = vsel %vm1019_vm1, %v3214_v56, 0.0 }
 0x655   : > { %3219 = vadd.xlane.f32.xlu0 %v3218_v58 }
 0x6c0   : > { %v3217_v33 = vpop.xlane.xlu2 %3216 }
 0x6c1   : > { %v3221_v61 = vmul.f32 %v3217_v33, %v5090_v45 }
 0x6c3   : > { %v3223_v62 = vadd.f32 1e-05, %v3221_v61 }
 0x6c5   : > { %4582 = vrsqrt.f32 %v3223_v62  ;;  %vm3231_vm10 = vweird.f32 %v3223_v62 }
 0x6c8   : > { %v3220_v63 = vpop.xlane.xlu0 %3219 }
 0x6c9   : > { %v3222_v34 = vmul.f32 %v3220_v63, %v5090_v45 }
 0x6cb   : > { %v4583_v39 = vpop.eup %4582  ;;  %v3224_v1 = vadd.f32 1e-05, %v3222_v34 }
 0x6cc   : > { %v3226_v4 = vmul.f32 %v4583_v39, %v3223_v62  ;;  %vm3232_vm9 = vweird.f32 %v4583_v39 }
 0x6cd   : > { %4584 = vrsqrt.f32 %v3224_v1  ;;  %vm3233_vm11 = vmor %vm3231_vm10, %vm3232_vm9  ;;  %vm3241_vm13 = vweird.f32 %v3224_v1 }
 0x6ce   : > { %v3227_v5 = vmul.f32 %v4583_v39, %v3226_v4 }
 0x6d0   : > { %v3228_v6 = vmul.f32 0.5, %v3227_v5 }
 0x6d2   : > { %v3229_v8 = vsub.f32 1.5, %v3228_v6 }
 0x6d3   : > { %v4585_v11 = vpop.eup %4584 }
 0x6d4   : > { %v3230_v12 = vmul.f32 %v4583_v39, %v3229_v8  ;;  %v3236_v13 = vmul.f32 %v4585_v11, %v3224_v1  ;;  %vm3242_vm12 = vweird.f32 %v4585_v11 }
 0x6d5   : > { %vm3243_vm14 = vmor %vm3241_vm13, %vm3242_vm12 }
 0x6d6   : > { %v3234_v45 = vsel %vm3233_vm11, %v4583_v39, %v3230_v12  ;;  %v3237_v18 = vmul.f32 %v4585_v11, %v3236_v13 }
 0x6d7   : > { %v3245_v20 = vmul.f32 %v3234_v45, %v3211_v53 }
 0x6d8   : > { %v3238_v44 = vmul.f32 0.5, %v3237_v18 }
 0x6d9   : > { %v3250_v21 = vmul.f32 %v4566_v15, %v3245_v20 }
 0x6da   : > { %v3239_v40 = vsub.f32 1.5, %v3238_v44 }
 0x6db   : > { %v3255_v28 = vadd.f32 %v4567_v19, %v3250_v21 }
 0x6dc   : > { %v3240_v46 = vmul.f32 %v4585_v11, %v3239_v40 }
 0x6dd   : > { %3257 = vst.msk [vmem:[#allocation2] sm:$0xff] %vm1019_vm1, %v3255_v28 }
 0x6de   : > { %v3244_v29 = vsel %vm3243_vm14, %v4585_v11, %v3240_v46 }
 0x6df   : > { %v3246_v52 = vmul.f32 %v3244_v29, %v3212_v55 }
 0x6e1   : > { %v3251_v23 = vmul.f32 %v4566_v15, %v3246_v52  ;;  %3262 = sbr.rel (%p4346_p5) target bundleno = 1930 (0x78a), region = 116 }
 0x6e3   : > { %v3256_v24 = vadd.f32 %v4567_v19, %v3251_v23 }
 0x6e5   : > { %3258 = vst.msk [vmem:[#allocation2 + $0x8] sm:$0xff] %vm1019_vm1, %v3256_v24 }
 0x6e6   : > { %v3352_v57 = vld [vmem:[%s5512_s8 + $0x18] sm:$0xff]  ;;  %v3351_v60 = vld [vmem:[%s5512_s8 + $0x10] sm:$0xff]  ;;  %v3265_v27 = vrot.slane %v3255_v28, 2  ;;  %v3350_v30 = vld [vmem:[%s5512_s8 + $0x8] sm:$0xff]  ;;  %v3266_v2 = vrot.slane %v3255_v28, 4  ;;  %v3267_v0 = vrot.slane %v3255_v28, 6 }
 0x6e7   : > { %3393 = vmatpush.msra.mxu0 %v3352_v57  ;;  %vm3277_vm15 = vcmask 254976   ;;  %v3349_v3 = vld [vmem:[%s5512_s8] sm:$0xff]  ;;  %v3268_v37 = vrot.slane %v3256_v24, 2  ;;  %v3269_v31 = vrot.slane %v3256_v24, 4  ;;  %v3270_v9 = vrot.slane %v3256_v24, 6 }
 0x6e8   : > { %v3278_v7 = vsel %vm3277_vm15, %v3255_v28, 0.0  ;;  %v3285_v38 = vsel %vm3277_vm15, %v3265_v27, 0.0  ;;  %v3292_v16 = vsel %vm3277_vm15, %v3266_v2, 0.0  ;;  %v3299_v14 = vsel %vm3277_vm15, %v3267_v0, 0.0 }
 0x6e9   : > { %3394 = vmatpush.msra.mxu0 %v3351_v60  ;;  %v3306_v51 = vsel %vm3277_vm15, %v3256_v24, 0.0  ;;  %v3279_v17 = vrot.slane %v3278_v7, 4  ;;  %v3286_v22 = vrot.slane %v3285_v38, 4  ;;  %v3313_v25 = vsel %vm3277_vm15, %v3268_v37, 0.0 }
 0x6ea   : > { %v3293_v35 = vrot.slane %v3292_v16, 4  ;;  %v3300_v36 = vrot.slane %v3299_v14, 4  ;;  %v3320_v59 = vsel %vm3277_vm15, %v3269_v31, 0.0  ;;  %v3327_v41 = vsel %vm3277_vm15, %v3270_v9, 0.0 }
 0x6eb   : > { %3395 = vmatpush.msra.mxu0 %v3350_v30  ;;  %v3307_v42 = vrot.slane %v3306_v51, 4  ;;  %v3314_v32 = vrot.slane %v3313_v25, 4  ;;  %v3280_v43 = vadd.f32 %v3279_v17, %v3278_v7  ;;  %v3321_v10 = vrot.slane %v3320_v59, 4 }
 0x6ec   : > { %v3328_v49 = vrot.slane %v3327_v41, 4  ;;  %v3287_v50 = vadd.f32 %v3286_v22, %v3285_v38  ;;  %v3294_v53 = vadd.f32 %v3293_v35, %v3292_v16  ;;  %v3301_v54 = vadd.f32 %v3300_v36, %v3299_v14 }
 0x6ed   : > { %3396 = vmatpush.msra.mxu0 %v3349_v3  ;;  %v3308_v26 = vadd.f32 %v3307_v42, %v3306_v51  ;;  %v3315_v47 = vadd.f32 %v3314_v32, %v3313_v25  ;;  %v3281_v48 = vrot.slane %v3280_v43, 2  ;;  %v3322_v55 = vadd.f32 %v3321_v10, %v3320_v59 }
 0x6ee   : > { %v3329_v56 = vadd.f32 %v3328_v49, %v3327_v41  ;;  %v3288_v58 = vrot.slane %v3287_v50, 2  ;;  %v3295_v33 = vrot.slane %v3294_v53, 2  ;;  %v3302_v61 = vrot.slane %v3301_v54, 2 }
 0x6ef   : > { %v4630_v62 = vmov 2.0   ;;  %v3309_v63 = vrot.slane %v3308_v26, 2  ;;  %v3316_v34 = vrot.slane %v3315_v47, 2  ;;  %v3282_v39 = vadd.f32 %v3281_v48, %v3280_v43  ;;  %v4586_v43 = vld [vmem:[%s5513_s5] ss:$0 sm:$0xff] }
 0x6f0   : > { %4587 = vrcp.f32 %v4630_v62  ;;  %v3323_v1 = vrot.slane %v3322_v55, 2  ;;  %v3330_v4 = vrot.slane %v3329_v56, 2  ;;  %v3289_v5 = vadd.f32 %v3288_v58, %v3287_v50 }
 0x6f1   : > { %v3296_v6 = vadd.f32 %v3295_v33, %v3294_v53  ;;  %v3303_v8 = vadd.f32 %v3302_v61, %v3301_v54  ;;  %v3310_v11 = vadd.f32 %v3309_v63, %v3308_v26  ;;  %v3317_v13 = vadd.f32 %v3316_v34, %v3315_v47 }
 0x6f2   : > { %v3283_v15 = vrot.slane %v3282_v39, 1  ;;  %v3324_v45 = vadd.f32 %v3323_v1, %v3322_v55  ;;  %v3331_v18 = vadd.f32 %v3330_v4, %v3329_v56  ;;  %v3290_v20 = vrot.slane %v3289_v5, 1 }
 0x6f3   : > { %v3297_v44 = vrot.slane %v3296_v6, 1  ;;  %v3304_v21 = vrot.slane %v3303_v8, 1  ;;  %v3311_v40 = vrot.slane %v3310_v11, 1  ;;  %v3318_v46 = vrot.slane %v3317_v13, 1 }
 0x6f4   : > { %v3284_v29 = vadd.f32 %v3283_v15, %v3282_v39  ;;  %v3325_v52 = vrot.slane %v3324_v45, 1  ;;  %v3332_v23 = vrot.slane %v3331_v18, 1  ;;  %v3291_v57 = vadd.f32 %v3290_v20, %v3289_v5 }
 0x6f5   : > { %v3298_v60 = vadd.f32 %v3297_v44, %v3296_v6  ;;  %v3305_v27 = vadd.f32 %v3304_v21, %v3303_v8  ;;  %v3312_v30 = vadd.f32 %v3311_v40, %v3310_v11  ;;  %v3319_v0 = vadd.f32 %v3318_v46, %v3317_v13 }
 0x6f6   : > { %v4588_v12 = vpop.eup %4587  ;;  %vm3365_vm2 = vcmask 1041409   ;;  %v3326_v3 = vadd.f32 %v3325_v52, %v3324_v45  ;;  %v3333_v37 = vadd.f32 %v3332_v23, %v3331_v18  ;;  %vm3367_vm3 = vcmask 1042434  }
 0x6f7   : > { %v3335_v19 = vmul.f32 2.0, %v4588_v12  ;;  %vm3339_vm0 = vweird.f32 %v4588_v12  ;;  %vm3369_vm4 = vcmask 1043459   ;;  %vm3371_vm5 = vcmask 1044484  }
 0x6f8   : > { %vm3373_vm6 = vcmask 1045509   ;;  %vm3375_vm7 = vcmask 1046534   ;;  %vm3377_vm8 = vcmask 1047559  }
 0x6f9   : > { %v3336_v28 = vsub.f32 1.0, %v3335_v19 }
 0x6fb   : > { %v3337_v24 = vmul.f32 %v4588_v12, %v3336_v28 }
 0x6fd   : > { %v3338_v2 = vadd.f32 %v4588_v12, %v3337_v24 }
 0x6ff   : > { %v3340_v31 = vsel %vm3339_vm0, %v4588_v12, %v3338_v2 }
 0x700   : > { %v3341_v9 = vmul.f32 %v3340_v31, %v3284_v29  ;;  %v3342_v7 = vmul.f32 %v3340_v31, %v3291_v57  ;;  %v3343_v38 = vmul.f32 %v3340_v31, %v3298_v60  ;;  %v3344_v16 = vmul.f32 %v3340_v31, %v3305_v27 }
 0x701   : > { %v3345_v14 = vmul.f32 %v3340_v31, %v3312_v30  ;;  %v3346_v51 = vmul.f32 %v3340_v31, %v3319_v0  ;;  %v3347_v22 = vmul.f32 %v3340_v31, %v3326_v3  ;;  %v3348_v35 = vmul.f32 %v3340_v31, %v3333_v37 }
 0x702   : > { %v3366_v17 = vsel %vm3365_vm2, %v3342_v7, %v3341_v9 }
 0x703   : > { %v3368_v25 = vsel %vm3367_vm3, %v3343_v38, %v3366_v17 }
 0x704   : > { %v3370_v36 = vsel %vm3369_vm4, %v3344_v16, %v3368_v25 }
 0x705   : > { %v3372_v59 = vsel %vm3371_vm5, %v3345_v14, %v3370_v36 }
 0x706   : > { %v3374_v41 = vsel %vm3373_vm6, %v3346_v51, %v3372_v59 }
 0x707   : > { %v3376_v42 = vsel %vm3375_vm7, %v3347_v22, %v3374_v41 }
 0x708   : > { %v3378_v32 = vsel %vm3377_vm8, %v3348_v35, %v3376_v42 }
 0x709   : > { %4347 = vmatmul.msk.f32.vlgmr.msra.gmra.mxu0 %vm1019_vm1, %v3378_v32 }
 0x786   : > { %v3398_v10 = vpop.f32.mrf.mxu0 }
 0x787   : > { %v3399_v49 = vadd.f32 %v4586_v43, %v3398_v10 }
 0x789   : > { %3401 = vst [vmem:[#allocation3] sm:$0xff] %v3399_v49 }
 0x78a PF: > { %s5514_s30 = sld [smem:[#allocation7_spill]]  ;;  %s4631_s19 = smov [#allocation3]  }
 0x78b   : > { %s3408_s6 = sshll.u32 %s4631_s19, 4  ;;  %s5515_s22 = sld [smem:[#allocation23_spill]]  ;;  %s3409_s6 = int_to_ptr.vmem [resolvable:$true] %s3408_s6 }
 0x790   : > { %p4538_p6 = scmp.eq.s32.totalorder %s5514_s30, 1 }
 0x791   : > { %s3410_s4 = sshll.u32 %s5515_s22, 4  ;;  %s3411_s4 = int_to_ptr.hbm [resolvable:$true] %s3410_s4 }
 0x792   : > { %4535 = dma.vmem_to_hbm [thread:$0]  (%p4538_p6), %s3409_s6, 128, %s3411_s4, [#allocation4]  }
 0x793   : > { %4622 = dma.done.wait (%p4538_p6), [#allocation4], 128  }
 0x794   : > { %4624 = vsyncadd (%p4538_p6), [#allocation4], 4294967168 }
 0x795 PF: > { %s5516_s29 = sld [smem:[#allocation6_spill]] }
 0x79b   : > { %s33_s3 = sadd.s32 1, %s5516_s29  }
 0x79c   : > { %p30_p7 = scmp.ge.s32.totalorder %s33_s3, 4  }
 0x79e   :  { %32 = sbr.rel (!%p30_p7) target bundleno = 17 (0x11), region = 195 }
 0x7a3   :  { %3424 = vsyncpa [#allocation4], 1 }
 0x7a4   :  { %3426 = vsyncpa [#allocation4 + $0x1], 1 }

</bundles_post_ra>
